<compile_context>
chip_gen: v7x
topology: tpu7x:2x2x1
jax: 0.10.0
libtpu: 0.0.40
codegen_flags: <defaults>
</compile_context>

<pallas_src>
import functools

import jax
import jax.numpy as jnp
from jax import lax
from jax.experimental import pallas as pl
from jax.experimental.pallas import tpu as pltpu

EPS = 1e-5      # PyTorch BatchNorm2d default eps
LANE = 128      # TPU lane width


# --------------------------------------------------------------------------
# Helpers
# --------------------------------------------------------------------------
def _vmem_limit_bytes():
    """Generation-aware VMEM budget (v7x has only 64 MiB per TensorCore)."""
    try:
        cap = int(pltpu.get_tpu_info().vmem_capacity_bytes)
    except Exception:  # pragma: no cover - conservative fallback
        cap = 64 << 20
    return max(16 << 20, min(cap * 3 // 4, 100 << 20))


def _pick_tile_h(H, W, Cin, Cout, in_itemsize, budget_bytes):
    """Largest row-tile TH dividing H with lane-aligned TH*W that fits VMEM."""
    divs = [t for t in range(1, H + 1) if H % t == 0]
    legal = [t for t in divs if (t * W) % LANE == 0] or [H]

    def vmem_bytes(t):
        rows = t * W
        tile_in = 2 * (t + 2) * (W + 2) * Cin * in_itemsize   # double-buffered input
        patches = rows * 9 * Cin * in_itemsize                # im2col patch matrix
        y = rows * Cout * 4                                   # f32 conv tile
        out = 2 * rows * Cout * 4                             # double-buffered output
        return tile_in + patches + y + out

    fitting = [t for t in legal if vmem_bytes(t) <= budget_bytes]
    return max(fitting) if fitting else min(legal)


def _im2col_patches(top_ref, mid_ref, bot_ref):
    """Assemble the halo'd tile and build the (TH*W, 9*Cin) patch matrix.

    top/bot: (1, W+2, Cin)   one-row halos (already zero at image borders)
    mid:     (TH, W+2, Cin)  column-padded input rows of this tile
    """
    x = jnp.concatenate([top_ref[...], mid_ref[...], bot_ref[...]], axis=0)
    THp, Wp, Cin = x.shape
    TH, W = THp - 2, Wp - 2
    # Nine shifted views concatenated on the channel (lane) axis -> one fused
    # MXU matmul with K = 9*Cin instead of nine tiny K=Cin matmuls.
    patches = jnp.concatenate(
        [x[kh:kh + TH, kw:kw + W, :] for kh in range(3) for kw in range(3)],
        axis=-1,
    )
    return patches.reshape(TH * W, 9 * Cin)


# --------------------------------------------------------------------------
# Pass 1: 3x3 conv (fused matmul) -> per-tile BN partials only (no conv write).
# --------------------------------------------------------------------------
def conv_stats_kernel(top_ref, mid_ref, bot_ref, w_ref, sum_ref, m2_ref):
    patches = _im2col_patches(top_ref, mid_ref, bot_ref)        # (TH*W, 9*Cin)
    # (Cout, 9*Cin) x (TH*W, 9*Cin)^T  ->  (Cout, TH*W), f32 accumulation.
    y = lax.dot_general(w_ref[...], patches,
                        (((1,), (1,)), ((), ())),
                        preferred_element_type=jnp.float32)
    rows = y.shape[1]
    s = jnp.sum(y, axis=1, keepdims=True)                       # (Cout, 1)
    d = y - s * (1.0 / rows)                                    # centered (Welford/Chan)
    sum_ref[...] = s
    m2_ref[...] = jnp.sum(d * d, axis=1, keepdims=True)         # (Cout, 1)


# --------------------------------------------------------------------------
# Pass 2: recompute conv, apply folded BN scale/shift + ReLU, store channel-
#         major so the final NCHW reshape in the wrapper is metadata-only.
# --------------------------------------------------------------------------
def conv_bn_relu_kernel(top_ref, mid_ref, bot_ref, w_ref,
                        scale_ref, shift_ref, o_ref):
    patches = _im2col_patches(top_ref, mid_ref, bot_ref)
    y = lax.dot_general(w_ref[...], patches,
                        (((1,), (1,)), ((), ())),
                        preferred_element_type=jnp.float32)     # (Cout, TH*W)
    y = jnp.maximum(y * scale_ref[...] + shift_ref[...], 0.0)
    o_ref[...] = y.astype(o_ref.dtype)


# --------------------------------------------------------------------------
# Wrapper
# --------------------------------------------------------------------------
def unit_forward(x_nchw, weight, bias, gamma, beta, *,
                 tile_h=None, mxu_dtype=jnp.bfloat16):
    """x_nchw: (N, Cin, H, W); weight: (Cout, Cin, 3, 3) (PyTorch OIHW)."""
    del bias  # exactly cancelled by training-mode BN mean subtraction

    N, Cin, H, W = x_nchw.shape
    Cout = weight.shape[0]
    K = 9 * Cin

    vmem_limit = _vmem_limit_bytes()
    if tile_h is None:
        tile_h = _pick_tile_h(H, W, Cin, Cout,
                              jnp.dtype(mxu_dtype).itemsize,
                              budget_bytes=vmem_limit // 2)
    TH = tile_h
    assert H % TH == 0, "tile_h must divide H"
    nT = H // TH
    ROWS = TH * W
    assert ROWS % LANE == 0 or TH == H, \
        "tile rows (TH*W) must be a multiple of 128, or TH must equal H"

    # ---- layout prep (one fused transpose + 1-col pad + cast over the input) --
    x_nhwc = jnp.transpose(x_nchw, (0, 2, 3, 1)).astype(jnp.float32)
    x_cp = jnp.pad(x_nhwc, ((0, 0), (0, 0), (1, 1), (0, 0)))     # columns only
    x_mid = x_cp.astype(mxu_dtype)                               # (N, H, W+2, Cin)

    # One-row halos above/below each tile (zero at image borders).  Tiny gather
    # (2 rows per tile) instead of duplicating the whole input with a halo.
    above = jnp.arange(nT) * TH - 1
    below = jnp.arange(nT) * TH + TH

    def _halo(idx, valid):
        rows = jnp.where(valid[None, :, None, None],
                         x_cp[:, jnp.clip(idx, 0, H - 1)], 0.0)  # (N, nT, W+2, Cin)
        return rows[:, :, None, :, :].astype(mxu_dtype)          # (N, nT, 1, W+2, Cin)

    x_top = _halo(above, above >= 0)
    x_bot = _halo(below, below < H)

    # Weights: (Cout, Cin, 3, 3) -> (Cout, kh, kw, Cin) -> (Cout, 9*Cin).
    w2 = jnp.transpose(weight, (0, 2, 3, 1)).reshape(Cout, K).astype(mxu_dtype)

    halo_spec = pl.BlockSpec((None, None, 1, W + 2, Cin),
                             lambda n, t: (n, t, 0, 0, 0))
    mid_spec = pl.BlockSpec((None, TH, W + 2, Cin), lambda n, t: (n, t, 0, 0))
    w_spec = pl.BlockSpec((Cout, K), lambda n, t: (0, 0))        # resident weights
    vec_spec = pl.BlockSpec((Cout, 1), lambda n, t: (0, 0))      # resident scale/shift
    stat_spec = pl.BlockSpec((None, None, Cout, 1), lambda n, t: (n, t, 0, 0))

    cparams = pltpu.CompilerParams(
        dimension_semantics=("parallel", "parallel"),            # megacore sharding
        vmem_limit_bytes=vmem_limit,
    )

    # ---- pass 1: conv + per-tile BN partials (sum, M2) ----------------------
    part_sum, part_m2 = pl.pallas_call(
        conv_stats_kernel,
        grid=(N, nT),
        in_specs=[halo_spec, mid_spec, halo_spec, w_spec],
        out_specs=[stat_spec, stat_spec],
        out_shape=[jax.ShapeDtypeStruct((N, nT, Cout, 1), jnp.float32),
                   jax.ShapeDtypeStruct((N, nT, Cout, 1), jnp.float32)],
        compiler_params=cparams,
    )(x_top, x_mid, x_bot, w2)

    # ---- combine per-tile partials (Chan's parallel variance merge) ---------
    count = jnp.float32(N * H * W)
    tile_sum = part_sum[..., 0]                                  # (N, nT, Cout)
    mean = jnp.sum(tile_sum, axis=(0, 1)) / count                # (Cout,)
    tile_mean = tile_sum / jnp.float32(ROWS)
    m2 = (jnp.sum(part_m2[..., 0], axis=(0, 1))
          + jnp.float32(ROWS) * jnp.sum((tile_mean - mean) ** 2, axis=(0, 1)))
    var = m2 / count                                             # biased (training BN)
    inv_std = lax.rsqrt(var + EPS)
    g = gamma.astype(jnp.float32)
    b = beta.astype(jnp.float32)
    scale = (g * inv_std).reshape(Cout, 1)                       # folded gamma / std
    shift = (b - mean * g * inv_std).reshape(Cout, 1)

    # ---- pass 2: recompute conv, apply BN + ReLU, write channel-major -------
    out = pl.pallas_call(
        conv_bn_relu_kernel,
        grid=(N, nT),
        in_specs=[halo_spec, mid_spec, halo_spec, w_spec, vec_spec, vec_spec],
        out_specs=pl.BlockSpec((None, Cout, ROWS), lambda n, t: (n, 0, t)),
        out_shape=jax.ShapeDtypeStruct((N, Cout, H * W), x_nchw.dtype),
        compiler_params=cparams,
    )(x_top, x_mid, x_bot, w2, scale, shift)

    # (N, Cout, H*W) -> (N, Cout, H, W): contiguous, metadata-only reshape.
    return out.reshape(N, Cout, H, W)


def unit_reference(x_nchw, weight, bias, gamma, beta):
    """Pure-JAX reference (conv + training-mode BN + ReLU) for correctness."""
    y = lax.conv_general_dilated(
        x_nchw.astype(jnp.float32), weight.astype(jnp.float32),
        window_strides=(1, 1), padding=((1, 1), (1, 1)),
        dimension_numbers=("NCHW", "OIHW", "NCHW"))
    y = y + bias.reshape(1, -1, 1, 1)
    mean = jnp.mean(y, axis=(0, 2, 3), keepdims=True)
    var = jnp.mean((y - mean) ** 2, axis=(0, 2, 3), keepdims=True)
    y = (y - mean) * lax.rsqrt(var + EPS)
    y = y * gamma.reshape(1, -1, 1, 1) + beta.reshape(1, -1, 1, 1)
    return jnp.maximum(y, 0.0)


if __name__ == "__main__":
    N, Cin, Cout, H, W = 2, 4, 8, 16, 16

    key = jax.random.PRNGKey(0)
    kx, kw, kb = jax.random.split(key, 3)

    x = jax.random.normal(kx, (N, Cin, H, W), dtype=jnp.float32)

    # Deterministic "PyTorch-like" init: uniform conv weight/bias, BN gamma=1, beta=0.
    fan_in = Cin * 3 * 3
    bound = 1.0 / jnp.sqrt(jnp.float32(fan_in))
    weight = jax.random.uniform(kw, (Cout, Cin, 3, 3), jnp.float32, -bound, bound)
    bias = jax.random.uniform(kb, (Cout,), jnp.float32, -bound, bound)
    gamma = jnp.ones((Cout,), jnp.float32)
    beta = jnp.zeros((Cout,), jnp.float32)

    ref = unit_reference(x, weight, bias, gamma, beta)

    # tile_h=8 -> grid (N=2, row_tiles=2) to exercise the tiled / halo path.
    # 1) f32 MXU path: tight correctness check.
    fwd_f32 = jax.jit(functools.partial(unit_forward, tile_h=8,
                                        mxu_dtype=jnp.float32))
    out_f32 = jax.block_until_ready(fwd_f32(x, weight, bias, gamma, beta))
    assert out_f32.shape == (N, Cout, H, W)
    assert jnp.allclose(out_f32, ref, atol=1e-4, rtol=1e-4), "f32 mismatch vs reference"

    # 2) default bf16 MXU path (the performance configuration): looser tolerance.
    fwd_bf16 = jax.jit(functools.partial(unit_forward, tile_h=8))
    out_bf16 = jax.block_until_ready(fwd_bf16(x, weight, bias, gamma, beta))
    assert out_bf16.shape == (N, Cout, H, W)
    assert jnp.allclose(out_bf16, ref, atol=5e-2, rtol=5e-2), "bf16 mismatch vs reference"

    print("KERNEL_OK")
</pallas_src>

<mosaic_0001>
module attributes {stable_mosaic.version = 11 : i64} {
  func.func @conv_stats_kernel(%arg0: i32, %arg1: i32, %arg2: memref<1x1x1x18x4xf32, #tpu.memory_space<vmem>>, %arg3: memref<1x8x18x4xf32, #tpu.memory_space<vmem>>, %arg4: memref<1x1x1x18x4xf32, #tpu.memory_space<vmem>>, %arg5: memref<8x36xf32, #tpu.memory_space<vmem>>, %arg6: memref<1x1x8x1xf32, #tpu.memory_space<vmem>>, %arg7: memref<1x1x8x1xf32, #tpu.memory_space<vmem>>) attributes {dimension_semantics = [#tpu.dimension_semantics<parallel>, #tpu.dimension_semantics<parallel>], iteration_bounds = array<i64: 2, 2>, scalar_prefetch = 0 : i64, scratch_operands = 0 : i64, tpu.core_type = #tpu.core_type<tc>, window_params = [{transform_indices = @transform_0, window_bounds = array<i64: 1, 1, 1, 18, 4>}, {transform_indices = @transform_1, window_bounds = array<i64: 1, 8, 18, 4>}, {transform_indices = @transform_2, window_bounds = array<i64: 1, 1, 1, 18, 4>}, {pipeline_mode = #tpu.pipeline_mode<synchronous>, transform_indices = @transform_3, window_bounds = array<i64: 8, 36>}, {transform_indices = @transform_4, window_bounds = array<i64: 1, 1, 8, 1>}, {transform_indices = @transform_5, window_bounds = array<i64: 1, 1, 8, 1>}]} {
    %c0 = arith.constant 0 : index
    %c0_0 = arith.constant 0 : index
    %c0_1 = arith.constant 0 : index
    %c0_2 = arith.constant 0 : index
    %c0_3 = arith.constant 0 : index
    %0 = vector.load %arg2[%c0, %c0_0, %c0_1, %c0_2, %c0_3] : memref<1x1x1x18x4xf32, #tpu.memory_space<vmem>>, vector<1x1x1x18x4xf32>
    %1 = vector.shape_cast %0 : vector<1x1x1x18x4xf32> to vector<1x18x4xf32>
    %c0_4 = arith.constant 0 : index
    %c0_5 = arith.constant 0 : index
    %c0_6 = arith.constant 0 : index
    %c0_7 = arith.constant 0 : index
    %2 = vector.load %arg3[%c0_4, %c0_5, %c0_6, %c0_7] : memref<1x8x18x4xf32, #tpu.memory_space<vmem>>, vector<1x8x18x4xf32>
    %3 = vector.shape_cast %2 : vector<1x8x18x4xf32> to vector<8x18x4xf32>
    %c0_8 = arith.constant 0 : index
    %c0_9 = arith.constant 0 : index
    %c0_10 = arith.constant 0 : index
    %c0_11 = arith.constant 0 : index
    %c0_12 = arith.constant 0 : index
    %4 = vector.load %arg4[%c0_8, %c0_9, %c0_10, %c0_11, %c0_12] : memref<1x1x1x18x4xf32, #tpu.memory_space<vmem>>, vector<1x1x1x18x4xf32>
    %5 = vector.shape_cast %4 : vector<1x1x1x18x4xf32> to vector<1x18x4xf32>
    %6 = tpu.concatenate %1, %3, %5 in 0 : vector<1x18x4xf32>, vector<8x18x4xf32>, vector<1x18x4xf32> -> vector<10x18x4xf32>
    %7 = vector.extract_strided_slice %6 {offsets = [0, 0, 0], sizes = [8, 16, 4], strides = [1, 1, 1]} : vector<10x18x4xf32> to vector<8x16x4xf32>
    %8 = vector.extract_strided_slice %6 {offsets = [0, 1, 0], sizes = [8, 16, 4], strides = [1, 1, 1]} : vector<10x18x4xf32> to vector<8x16x4xf32>
    %9 = vector.extract_strided_slice %6 {offsets = [0, 2, 0], sizes = [8, 16, 4], strides = [1, 1, 1]} : vector<10x18x4xf32> to vector<8x16x4xf32>
    %10 = vector.extract_strided_slice %6 {offsets = [1, 0, 0], sizes = [8, 16, 4], strides = [1, 1, 1]} : vector<10x18x4xf32> to vector<8x16x4xf32>
    %11 = vector.extract_strided_slice %6 {offsets = [1, 1, 0], sizes = [8, 16, 4], strides = [1, 1, 1]} : vector<10x18x4xf32> to vector<8x16x4xf32>
    %12 = vector.extract_strided_slice %6 {offsets = [1, 2, 0], sizes = [8, 16, 4], strides = [1, 1, 1]} : vector<10x18x4xf32> to vector<8x16x4xf32>
    %13 = vector.extract_strided_slice %6 {offsets = [2, 0, 0], sizes = [8, 16, 4], strides = [1, 1, 1]} : vector<10x18x4xf32> to vector<8x16x4xf32>
    %14 = vector.extract_strided_slice %6 {offsets = [2, 1, 0], sizes = [8, 16, 4], strides = [1, 1, 1]} : vector<10x18x4xf32> to vector<8x16x4xf32>
    %15 = vector.extract_strided_slice %6 {offsets = [2, 2, 0], sizes = [8, 16, 4], strides = [1, 1, 1]} : vector<10x18x4xf32> to vector<8x16x4xf32>
    %16 = tpu.concatenate %7, %8, %9, %10, %11, %12, %13, %14, %15 in 2 : vector<8x16x4xf32>, vector<8x16x4xf32>, vector<8x16x4xf32>, vector<8x16x4xf32>, vector<8x16x4xf32>, vector<8x16x4xf32>, vector<8x16x4xf32>, vector<8x16x4xf32>, vector<8x16x4xf32> -> vector<8x16x36xf32>
    %17 = vector.shape_cast %16 : vector<8x16x36xf32> to vector<128x36xf32>
    %c0_13 = arith.constant 0 : index
    %c0_14 = arith.constant 0 : index
    %18 = vector.load %arg5[%c0_13, %c0_14] : memref<8x36xf32, #tpu.memory_space<vmem>>, vector<8x36xf32>
    %cst = arith.constant dense<0.000000e+00> : vector<8x128xf32>
    %19 = tpu.matmul %18, %17, %cst {dimension_numbers = #tpu.dot_dimension_numbers<[1], [1], [0], [0], [0, 0, 1, 0], [], []>} : vector<8x36xf32>, vector<128x36xf32>, vector<8x128xf32> -> vector<8x128xf32>
    %cst_15 = arith.constant dense<0.000000e+00> : vector<8xf32>
    %20 = vector.multi_reduction <add>, %19, %cst_15 [1] : vector<8x128xf32> to vector<8xf32>
    %21 = vector.shape_cast %20 : vector<8xf32> to vector<8x1xf32>
    %cst_16 = arith.constant 7.812500e-03 : f32
    %22 = vector.broadcast %cst_16 : f32 to vector<8x1xf32>
    %23 = arith.mulf %21, %22 : vector<8x1xf32>
    %24 = vector.broadcast %23 : vector<8x1xf32> to vector<8x128xf32>
    %25 = arith.subf %19, %24 : vector<8x128xf32>
    %c0_17 = arith.constant 0 : index
    %c0_18 = arith.constant 0 : index
    %c0_19 = arith.constant 0 : index
    %c0_20 = arith.constant 0 : index
    %26 = vector.load %arg6[%c0_17, %c0_18, %c0_19, %c0_20] : memref<1x1x8x1xf32, #tpu.memory_space<vmem>>, vector<1x1x8x1xf32>
    %27 = vector.shape_cast %26 : vector<1x1x8x1xf32> to vector<8x1xf32>
    %28 = vector.shape_cast %21 : vector<8x1xf32> to vector<1x1x8x1xf32>
    tpu.vector_store %arg6[%c0_17, %c0_18, %c0_19, %c0_20], %28 {strides = array<i32>} : memref<1x1x8x1xf32, #tpu.memory_space<vmem>>, vector<1x1x8x1xf32>,
    %29 = arith.mulf %25, %25 : vector<8x128xf32>
    %cst_21 = arith.constant dense<0.000000e+00> : vector<8xf32>
    %30 = vector.multi_reduction <add>, %29, %cst_21 [1] : vector<8x128xf32> to vector<8xf32>
    %31 = vector.shape_cast %30 : vector<8xf32> to vector<8x1xf32>
    %c0_22 = arith.constant 0 : index
    %c0_23 = arith.constant 0 : index
    %c0_24 = arith.constant 0 : index
    %c0_25 = arith.constant 0 : index
    %32 = vector.load %arg7[%c0_22, %c0_23, %c0_24, %c0_25] : memref<1x1x8x1xf32, #tpu.memory_space<vmem>>, vector<1x1x8x1xf32>
    %33 = vector.shape_cast %32 : vector<1x1x8x1xf32> to vector<8x1xf32>
    %34 = vector.shape_cast %31 : vector<8x1xf32> to vector<1x1x8x1xf32>
    tpu.vector_store %arg7[%c0_22, %c0_23, %c0_24, %c0_25], %34 {strides = array<i32>} : memref<1x1x8x1xf32, #tpu.memory_space<vmem>>, vector<1x1x8x1xf32>,
    return
  }
  func.func @transform_0(%arg0: i32, %arg1: i32) -> (i32, i32, i32, i32, i32) {
    %c0_i32 = arith.constant 0 : i32
    %c0_i32_0 = arith.constant 0 : i32
    %c0_i32_1 = arith.constant 0 : i32
    %c0_i32_2 = arith.constant 0 : i32
    return %arg0, %arg1, %c0_i32, %c0_i32_0, %c0_i32_1 : i32, i32, i32, i32, i32
  }
  func.func @transform_1(%arg0: i32, %arg1: i32) -> (i32, i32, i32, i32) {
    %c0_i32 = arith.constant 0 : i32
    %c0_i32_0 = arith.constant 0 : i32
    %c0_i32_1 = arith.constant 0 : i32
    return %arg0, %arg1, %c0_i32, %c0_i32_0 : i32, i32, i32, i32
  }
  func.func @transform_2(%arg0: i32, %arg1: i32) -> (i32, i32, i32, i32, i32) {
    %c0_i32 = arith.constant 0 : i32
    %c0_i32_0 = arith.constant 0 : i32
    %c0_i32_1 = arith.constant 0 : i32
    %c0_i32_2 = arith.constant 0 : i32
    return %arg0, %arg1, %c0_i32, %c0_i32_0, %c0_i32_1 : i32, i32, i32, i32, i32
  }
  func.func @transform_3(%arg0: i32, %arg1: i32) -> (i32, i32) {
    %c0_i32 = arith.constant 0 : i32
    %c0_i32_0 = arith.constant 0 : i32
    %c0_i32_1 = arith.constant 0 : i32
    return %c0_i32, %c0_i32_0 : i32, i32
  }
  func.func @transform_4(%arg0: i32, %arg1: i32) -> (i32, i32, i32, i32) {
    %c0_i32 = arith.constant 0 : i32
    %c0_i32_0 = arith.constant 0 : i32
    %c0_i32_1 = arith.constant 0 : i32
    return %arg0, %arg1, %c0_i32, %c0_i32_0 : i32, i32, i32, i32
  }
  func.func @transform_5(%arg0: i32, %arg1: i32) -> (i32, i32, i32, i32) {
    %c0_i32 = arith.constant 0 : i32
    %c0_i32_0 = arith.constant 0 : i32
    %c0_i32_1 = arith.constant 0 : i32
    return %arg0, %arg1, %c0_i32, %c0_i32_0 : i32, i32, i32, i32
  }
}

module attributes {stable_mosaic.version = 11 : i64} {
  func.func @conv_bn_relu_kernel(%arg0: i32, %arg1: i32, %arg2: memref<1x1x1x18x4xf32, #tpu.memory_space<vmem>>, %arg3: memref<1x8x18x4xf32, #tpu.memory_space<vmem>>, %arg4: memref<1x1x1x18x4xf32, #tpu.memory_space<vmem>>, %arg5: memref<8x36xf32, #tpu.memory_space<vmem>>, %arg6: memref<8x1xf32, #tpu.memory_space<vmem>>, %arg7: memref<8x1xf32, #tpu.memory_space<vmem>>, %arg8: memref<1x8x128xf32, #tpu.memory_space<vmem>>) attributes {dimension_semantics = [#tpu.dimension_semantics<parallel>, #tpu.dimension_semantics<parallel>], iteration_bounds = array<i64: 2, 2>, scalar_prefetch = 0 : i64, scratch_operands = 0 : i64, tpu.core_type = #tpu.core_type<tc>, window_params = [{transform_indices = @transform_0, window_bounds = array<i64: 1, 1, 1, 18, 4>}, {transform_indices = @transform_1, window_bounds = array<i64: 1, 8, 18, 4>}, {transform_indices = @transform_2, window_bounds = array<i64: 1, 1, 1, 18, 4>}, {pipeline_mode = #tpu.pipeline_mode<synchronous>, transform_indices = @transform_3, window_bounds = array<i64: 8, 36>}, {pipeline_mode = #tpu.pipeline_mode<synchronous>, transform_indices = @transform_4, window_bounds = array<i64: 8, 1>}, {pipeline_mode = #tpu.pipeline_mode<synchronous>, transform_indices = @transform_5, window_bounds = array<i64: 8, 1>}, {transform_indices = @transform_6, window_bounds = array<i64: 1, 8, 128>}]} {
    %c0 = arith.constant 0 : index
    %c0_0 = arith.constant 0 : index
    %c0_1 = arith.constant 0 : index
    %c0_2 = arith.constant 0 : index
    %c0_3 = arith.constant 0 : index
    %0 = vector.load %arg2[%c0, %c0_0, %c0_1, %c0_2, %c0_3] : memref<1x1x1x18x4xf32, #tpu.memory_space<vmem>>, vector<1x1x1x18x4xf32>
    %1 = vector.shape_cast %0 : vector<1x1x1x18x4xf32> to vector<1x18x4xf32>
    %c0_4 = arith.constant 0 : index
    %c0_5 = arith.constant 0 : index
    %c0_6 = arith.constant 0 : index
    %c0_7 = arith.constant 0 : index
    %2 = vector.load %arg3[%c0_4, %c0_5, %c0_6, %c0_7] : memref<1x8x18x4xf32, #tpu.memory_space<vmem>>, vector<1x8x18x4xf32>
    %3 = vector.shape_cast %2 : vector<1x8x18x4xf32> to vector<8x18x4xf32>
    %c0_8 = arith.constant 0 : index
    %c0_9 = arith.constant 0 : index
    %c0_10 = arith.constant 0 : index
    %c0_11 = arith.constant 0 : index
    %c0_12 = arith.constant 0 : index
    %4 = vector.load %arg4[%c0_8, %c0_9, %c0_10, %c0_11, %c0_12] : memref<1x1x1x18x4xf32, #tpu.memory_space<vmem>>, vector<1x1x1x18x4xf32>
    %5 = vector.shape_cast %4 : vector<1x1x1x18x4xf32> to vector<1x18x4xf32>
    %6 = tpu.concatenate %1, %3, %5 in 0 : vector<1x18x4xf32>, vector<8x18x4xf32>, vector<1x18x4xf32> -> vector<10x18x4xf32>
    %7 = vector.extract_strided_slice %6 {offsets = [0, 0, 0], sizes = [8, 16, 4], strides = [1, 1, 1]} : vector<10x18x4xf32> to vector<8x16x4xf32>
    %8 = vector.extract_strided_slice %6 {offsets = [0, 1, 0], sizes = [8, 16, 4], strides = [1, 1, 1]} : vector<10x18x4xf32> to vector<8x16x4xf32>
    %9 = vector.extract_strided_slice %6 {offsets = [0, 2, 0], sizes = [8, 16, 4], strides = [1, 1, 1]} : vector<10x18x4xf32> to vector<8x16x4xf32>
    %10 = vector.extract_strided_slice %6 {offsets = [1, 0, 0], sizes = [8, 16, 4], strides = [1, 1, 1]} : vector<10x18x4xf32> to vector<8x16x4xf32>
    %11 = vector.extract_strided_slice %6 {offsets = [1, 1, 0], sizes = [8, 16, 4], strides = [1, 1, 1]} : vector<10x18x4xf32> to vector<8x16x4xf32>
    %12 = vector.extract_strided_slice %6 {offsets = [1, 2, 0], sizes = [8, 16, 4], strides = [1, 1, 1]} : vector<10x18x4xf32> to vector<8x16x4xf32>
    %13 = vector.extract_strided_slice %6 {offsets = [2, 0, 0], sizes = [8, 16, 4], strides = [1, 1, 1]} : vector<10x18x4xf32> to vector<8x16x4xf32>
    %14 = vector.extract_strided_slice %6 {offsets = [2, 1, 0], sizes = [8, 16, 4], strides = [1, 1, 1]} : vector<10x18x4xf32> to vector<8x16x4xf32>
    %15 = vector.extract_strided_slice %6 {offsets = [2, 2, 0], sizes = [8, 16, 4], strides = [1, 1, 1]} : vector<10x18x4xf32> to vector<8x16x4xf32>
    %16 = tpu.concatenate %7, %8, %9, %10, %11, %12, %13, %14, %15 in 2 : vector<8x16x4xf32>, vector<8x16x4xf32>, vector<8x16x4xf32>, vector<8x16x4xf32>, vector<8x16x4xf32>, vector<8x16x4xf32>, vector<8x16x4xf32>, vector<8x16x4xf32>, vector<8x16x4xf32> -> vector<8x16x36xf32>
    %17 = vector.shape_cast %16 : vector<8x16x36xf32> to vector<128x36xf32>
    %c0_13 = arith.constant 0 : index
    %c0_14 = arith.constant 0 : index
    %18 = vector.load %arg5[%c0_13, %c0_14] : memref<8x36xf32, #tpu.memory_space<vmem>>, vector<8x36xf32>
    %cst = arith.constant dense<0.000000e+00> : vector<8x128xf32>
    %19 = tpu.matmul %18, %17, %cst {dimension_numbers = #tpu.dot_dimension_numbers<[1], [1], [0], [0], [0, 0, 1, 0], [], []>} : vector<8x36xf32>, vector<128x36xf32>, vector<8x128xf32> -> vector<8x128xf32>
    %c0_15 = arith.constant 0 : index
    %c0_16 = arith.constant 0 : index
    %20 = vector.load %arg6[%c0_15, %c0_16] : memref<8x1xf32, #tpu.memory_space<vmem>>, vector<8x1xf32>
    %21 = vector.broadcast %20 : vector<8x1xf32> to vector<8x128xf32>
    %22 = arith.mulf %19, %21 : vector<8x128xf32>
    %c0_17 = arith.constant 0 : index
    %c0_18 = arith.constant 0 : index
    %23 = vector.load %arg7[%c0_17, %c0_18] : memref<8x1xf32, #tpu.memory_space<vmem>>, vector<8x1xf32>
    %24 = vector.broadcast %23 : vector<8x1xf32> to vector<8x128xf32>
    %25 = arith.addf %22, %24 : vector<8x128xf32>
    %cst_19 = arith.constant 0.000000e+00 : f32
    %26 = vector.broadcast %cst_19 : f32 to vector<8x128xf32>
    %27 = arith.maximumf %25, %26 : vector<8x128xf32>
    %c0_20 = arith.constant 0 : index
    %c0_21 = arith.constant 0 : index
    %c0_22 = arith.constant 0 : index
    %28 = vector.load %arg8[%c0_20, %c0_21, %c0_22] : memref<1x8x128xf32, #tpu.memory_space<vmem>>, vector<1x8x128xf32>
    %29 = vector.shape_cast %28 : vector<1x8x128xf32> to vector<8x128xf32>
    %30 = vector.shape_cast %27 : vector<8x128xf32> to vector<1x8x128xf32>
    tpu.vector_store %arg8[%c0_20, %c0_21, %c0_22], %30 {strides = array<i32>} : memref<1x8x128xf32, #tpu.memory_space<vmem>>, vector<1x8x128xf32>,
    return
  }
  func.func @transform_0(%arg0: i32, %arg1: i32) -> (i32, i32, i32, i32, i32) {
    %c0_i32 = arith.constant 0 : i32
    %c0_i32_0 = arith.constant 0 : i32
    %c0_i32_1 = arith.constant 0 : i32
    %c0_i32_2 = arith.constant 0 : i32
    return %arg0, %arg1, %c0_i32, %c0_i32_0, %c0_i32_1 : i32, i32, i32, i32, i32
  }
  func.func @transform_1(%arg0: i32, %arg1: i32) -> (i32, i32, i32, i32) {
    %c0_i32 = arith.constant 0 : i32
    %c0_i32_0 = arith.constant 0 : i32
    %c0_i32_1 = arith.constant 0 : i32
    return %arg0, %arg1, %c0_i32, %c0_i32_0 : i32, i32, i32, i32
  }
  func.func @transform_2(%arg0: i32, %arg1: i32) -> (i32, i32, i32, i32, i32) {
    %c0_i32 = arith.constant 0 : i32
    %c0_i32_0 = arith.constant 0 : i32
    %c0_i32_1 = arith.constant 0 : i32
    %c0_i32_2 = arith.constant 0 : i32
    return %arg0, %arg1, %c0_i32, %c0_i32_0, %c0_i32_1 : i32, i32, i32, i32, i32
  }
  func.func @transform_3(%arg0: i32, %arg1: i32) -> (i32, i32) {
    %c0_i32 = arith.constant 0 : i32
    %c0_i32_0 = arith.constant 0 : i32
    %c0_i32_1 = arith.constant 0 : i32
    return %c0_i32, %c0_i32_0 : i32, i32
  }
  func.func @transform_4(%arg0: i32, %arg1: i32) -> (i32, i32) {
    %c0_i32 = arith.constant 0 : i32
    %c0_i32_0 = arith.constant 0 : i32
    %c0_i32_1 = arith.constant 0 : i32
    return %c0_i32, %c0_i32_0 : i32, i32
  }
  func.func @transform_5(%arg0: i32, %arg1: i32) -> (i32, i32) {
    %c0_i32 = arith.constant 0 : i32
    %c0_i32_0 = arith.constant 0 : i32
    %c0_i32_1 = arith.constant 0 : i32
    return %c0_i32, %c0_i32_0 : i32, i32
  }
  func.func @transform_6(%arg0: i32, %arg1: i32) -> (i32, i32, i32) {
    %c0_i32 = arith.constant 0 : i32
    %c0_i32_0 = arith.constant 0 : i32
    return %arg0, %c0_i32, %arg1 : i32, i32, i32
  }
}

</mosaic_0001>

<bundles_post_ra>
// kernel: unit_forward.2
= control target key start
LH: loop header
LB: loop body
LE: loop exit
PB: predicated region body
PF: predicated region fallthrough
CT: control target
= control target key end

     0   :  { %s1918_s18 = smov 0   ;;  %s1920_s19 = smov 0   ;;  %s2478_s0 = inlined_call_operand.vmem [shape: f32[2,2,1,18,4], index: 0, kind: input, shape index: {}]   ;;  %s2479_s1 = inlined_call_operand.vmem [shape: f32[2,16,18,4], index: 1, kind: input, shape index: {}]   ;;  %s2480_s2 = inlined_call_operand.vmem [shape: f32[2,2,1,18,4], index: 2, kind: input, shape index: {}]   ;;  %s2481_s3 = inlined_call_operand.vmem [shape: f32[8,36], index: 3, kind: input, shape index: {}]   ;;  %s2482_s4 = inlined_call_operand.vmem [shape: f32[2,2,8,1], index: 4, kind: output, shape index: {0}]   ;;  %s2483_s5 = inlined_call_operand.vmem [shape: f32[2,2,8,1], index: 5, kind: output, shape index: {1}]  }
   0x1   :  { %s1922_s20 = smov 0   ;;  %s1924_s21 = smov 0  }
   0x2   :  { %s1926_s22 = smov 0  }
   0x3 LB: > { %s25_s23 = sadd.s32 1, %s1867_s20  ;;  %s28_s24 = sadd.s32 1, %s1871_s21  ;;  %s1875_s22 = sphi %s1926_s22, %s16_s22   ;;  %s1871_s21 = sphi %s1924_s21, %s2489_s21   ;;  %s1867_s20 = sphi %s1922_s20, %s2488_s20   ;;  %s1863_s19 = sphi %s1920_s19, %s2487_s19   ;;  %s1859_s18 = sphi %s1918_s18, %s2486_s18  }
   0x4   : > { %p26_p0 = scmp.ge.s32.totalorder %s25_s23, 2  ;;  %p1350_p1 = scmp.ge.s32.totalorder %s1875_s22, 1 }
   0x5   : > { %p246_p2 = scmp.lt.s32.totalorder %s1875_s22, 5 }
   0x6   : > { %s2491_s23 = smov (%p26_p0, %s25_s23), 0  ;;  %s2493_s24 = smov (!%p26_p0, %s28_s24), %s1871_s21 }
   0x7   : > { %p247_p3 = pnand %p1350_p1, %p246_p2  ;;  %p30_p4 = scmp.ge.s32.totalorder %s2493_s24, 2 }
   0x8   : > { %p308_p5 = scmp.lt.s32.totalorder (!%p247_p3), %s1863_s19, 1  ;;  %s1352_s25 = sshll.u32 (!%p247_p3), %s1859_s18, 3  ;;  %vm407_vm0 = vcmask (!%p247_p3), 1046528   ;;  %vm496_vm1 = vcmask (!%p247_p3), 1045504   ;;  %vm899_vm2 = vcmask (!%p247_p3), 31744   ;;  %vm916_vm3 = vcmask (!%p247_p3), 64512  }
   0x9   : > { %s2495_s24 = smov (%p30_p4, %s2493_s24), 0  ;;  %250 = sbr.rel (%p247_p3) target bundleno = 786 (0x312), region = 36 }
   0xa   : > { %p320_p6 = scmp.lt.s32.totalorder (!%p247_p3), %s1352_s25, 15  ;;  %p310_p7 = scmp.lt.s32.totalorder (!%p247_p3), %s1859_s18, 1  ;;  %vm933_vm4 = vcmask (!%p247_p3), 97280   ;;  %vm950_vm5 = vcmask (!%p247_p3), 130048   ;;  %vm1886_vm6 = vmmov (!%p247_p3), 0   ;;  %vm967_vm7 = vcmask (!%p247_p3), 162816  }
   0xb   : > { %s1877_s15 = smov (!%p247_p3), 12   ;;  %s1878_s16 = smov (!%p247_p3), 24   ;;  %vm984_vm8 = vcmask (!%p247_p3), 195584   ;;  %vm1001_vm9 = vcmask (!%p247_p3), 228352   ;;  %vm1018_vm10 = vcmask (!%p247_p3), 261120   ;;  %vm1036_vm11 = vcmask (!%p247_p3), 293888  }
   0xc   : > { %s1879_s17 = smov (!%p247_p3), 4   ;;  %vm2298_vm12 = vmpackc.low (!%p247_p3), %vm1036_vm11, %vm1036_vm11  ;;  %vm1162_vm13 = vcmask (!%p247_p3), 7168  }
  0x10   : > { %s2497_s19 = smov (!%p308_p5, %s1863_s19), 1  ;;  %s2499_s25 = smov (!%p320_p6, %s1352_s25), 15 }
  0x11   : > { %s1465_s26 = smul.u32 48, %s2497_s19  ;;  %s2501_s18 = smov (!%p310_p7, %s1859_s18), 1 }
  0x12   : > { %s1464_s27 = smul.u32 3, %s2499_s25  ;;  %s1880_s25 = smov 16  }
  0x13   : > { %s1463_s29 = smul.u32 6, %s2497_s19 }
  0x14   : > { %s324_s28 = sadd.s32 %s1465_s26, %s1464_s27  ;;  %s1462_s6 = smul.u32 3, %s2501_s18 }
  0x15   : > { %s1353_s30 = sshll.u32 %s324_s28, 3  ;;  %s1881_s26 = smov 8  }
  0x16   : > { %s1958_s9 = scalar_lea.vmem %s2479_s1, %s1353_s30  ;;  %s1966_s10 = sadd.s32 %s1463_s29, %s1462_s6 }
  0x17   : > { %v1961_v0 = vld [vmem:[%s1958_s9] sm:$0xff]  ;;  %v1964_v1 = vld [vmem:[%s1958_s9 + $0x8] sm:$0xff]  ;;  %v1969_v2 = vld [vmem:[%s1958_s9 + $0x18] sm:$0xff]  ;;  %s1351_s11 = sshll.u32 %s1966_s10, 3  ;;  %s1882_s27 = smov 32  }
  0x18   : > { %v1517_v3 = vpack.i.bf16 %v1964_v1, %v1961_v0  ;;  %v1975_v4 = vld [vmem:[%s1958_s9 + $0x20] sm:$0xff]  ;;  %v358_v5 = vld [vmem:[%s1958_s9 + $0x10] sm:$0x3]  ;;  %v413_v6 = vrot.slane %v1961_v0, 1  ;;  %v414_v7 = vrot.slane %v1964_v1, 1  ;;  %s316_s14 = scalar_lea.vmem %s2478_s0, %s1351_s11  ;;  %v502_v14 = vrot.slane %v1961_v0, 2  ;;  %s336_s7 = scalar_lea.vmem %s2480_s2, %s1351_s11 }
  0x19   : > { %v416_v8 = vrot.slane %v358_v5, 1  ;;  %v1986_v9 = vld [vmem:[%s316_s14] sm:$0xff]  ;;  %v1988_v10 = vld [vmem:[%s316_s14 + $0x8] sm:$0xff]  ;;  %v355_v11 = vld [vmem:[%s316_s14 + $0x10] sm:$0x3]  ;;  %v1992_v12 = vpack.i.bf16 %v1975_v4, %v1969_v2  ;;  %v503_v15 = vrot.slane %v1964_v1, 2 }
  0x1a   : > { %1518 = vrot.lane.b32.xlu1 %v1517_v3, %s1877_s15  ;;  %v415_v13 = vsel %vm407_vm0, %v413_v6, %v414_v7  ;;  %v408_v16 = vrot.slane %v1986_v9, 1  ;;  %v409_v17 = vrot.slane %v1988_v10, 1  ;;  %v411_v18 = vrot.slane %v355_v11, 1  ;;  %v361_v26 = vld [vmem:[%s1958_s9 + $0x28] sm:$0x3]  ;;  %v2027_v46 = vld [vmem:[%s1958_s9 + $0x30] sm:$0xff] }
  0x1b   : > { %v500_v19 = vrot.slane %v355_v11, 2  ;;  %v497_v20 = vrot.slane %v1986_v9, 2  ;;  %v498_v21 = vrot.slane %v1988_v10, 2  ;;  %v417_v22 = vsel %vm407_vm0, %v414_v7, %v416_v8  ;;  %v2030_v47 = vld [vmem:[%s1958_s9 + $0x38] sm:$0xff]  ;;  %s1883_s28 = smov 20   ;;  %s1884_s29 = smov 28  }
  0x1c   : > { %v410_v23 = vsel %vm407_vm0, %v408_v16, %v409_v17  ;;  %v412_v24 = vsel %vm407_vm0, %v409_v17, %v411_v18  ;;  %v505_v25 = vrot.slane %v358_v5, 2  ;;  %v1537_v30 = vpack.i.bf16 %v417_v22, %v415_v13  ;;  %v364_v49 = vld [vmem:[%s1958_s9 + $0x40] sm:$0x3]  ;;  %v2050_v57 = vld [vmem:[%s1958_s9 + $0x78] sm:$0xff]  ;;  %v373_v59 = vld [vmem:[%s1958_s9 + $0x88] sm:$0x3] }
  0x1d   : > { %v1527_v27 = vpack.i.bf16 %v412_v24, %v410_v23  ;;  %v499_v28 = vsel %vm496_vm1, %v497_v20, %v498_v21  ;;  %v501_v29 = vsel %vm496_vm1, %v498_v21, %v500_v19  ;;  %v504_v31 = vsel %vm496_vm1, %v502_v14, %v503_v15  ;;  %v2053_v58 = vld [vmem:[%s1958_s9 + $0x80] sm:$0xff]  ;;  %v2062_v3 = vld [vmem:[%s1958_s9 + $0x48] sm:$0xff]  ;;  %v2075_v16 = vld [vmem:[%s1958_s9 + $0x90] sm:$0xff]  ;;  %s1355_s10 = sshll.u32 %s2497_s19, 1 }
  0x1e   : > { %1523 = vrot.lane.b32.xlu1 %v1992_v12, %s1878_s16  ;;  %v1532_v32 = vpack.i.bf16 %v501_v29, %v499_v28  ;;  %v507_v33 = vrot.slane %v1969_v2, 2  ;;  %v508_v34 = vrot.slane %v1975_v4, 2  ;;  %v510_v35 = vrot.slane %v361_v26, 2  ;;  %v2078_v17 = vld [vmem:[%s1958_s9 + $0x98] sm:$0xff]  ;;  %v376_v21 = vld [vmem:[%s1958_s9 + $0xa0] sm:$0x3]  ;;  %s342_s11 = sadd.s32 %s1355_s10, %s2501_s18 }
  0x1f   : > { %1528 = vrot.lane.b32.xlu0 %v1527_v27, %s1879_s17  ;;  %v506_v36 = vsel %vm496_vm1, %v503_v15, %v505_v25  ;;  %v418_v37 = vrot.slane %v1969_v2, 1  ;;  %v419_v38 = vrot.slane %v1975_v4, 1  ;;  %v421_v39 = vrot.slane %v361_v26, 1  ;;  %v2087_v22 = vld [vmem:[%s1958_s9 + $0x50] sm:$0xff]  ;;  %v2094_v26 = vld [vmem:[%s1958_s9 + $0x58] sm:$0x3] }
  0x20   : > { %v509_v40 = vsel %vm496_vm1, %v507_v33, %v508_v34  ;;  %v511_v41 = vsel %vm496_vm1, %v508_v34, %v510_v35  ;;  %v1542_v43 = vpack.i.bf16 %v506_v36, %v504_v31  ;;  %v423_v50 = vrot.slane %v2027_v46, 1  ;;  %v2107_v35 = vld [vmem:[%s1958_s9 + $0xa8] sm:$0xff]  ;;  %v2110_v36 = vld [vmem:[%s1958_s9 + $0xb0] sm:$0xff]  ;;  %s1356_s12 = sshll.u32 %s342_s11, 3 }
  0x21   : > { %v2019_v42 = vpack.i.bf16 %v511_v41, %v509_v40  ;;  %v420_v44 = vsel %vm407_vm0, %v418_v37, %v419_v38  ;;  %v422_v45 = vsel %vm407_vm0, %v419_v38, %v421_v39  ;;  %v424_v51 = vrot.slane %v2030_v47, 1  ;;  %v379_v37 = vld [vmem:[%s1958_s9 + $0xb8] sm:$0x3] }
  0x22   : > { %1538 = vrot.lane.b32.xlu1 %v1537_v30, %s1880_s25  ;;  %v2033_v48 = vpack.i.bf16 %v422_v45, %v420_v44  ;;  %v426_v52 = vrot.slane %v364_v49, 1  ;;  %v512_v53 = vrot.slane %v2027_v46, 2  ;;  %v513_v54 = vrot.slane %v2030_v47, 2 }
  0x23   : > { %1533 = vrot.lane.b32.xlu0 %v1532_v32, %s1881_s26  ;;  %v515_v55 = vrot.slane %v364_v49, 2  ;;  %v2047_v56 = vpack.i.bf16 %v2030_v47, %v2027_v46  ;;  %v425_v60 = vsel %vm407_vm0, %v423_v50, %v424_v51  ;;  %v438_v5 = vrot.slane %v2050_v57, 1 }
  0x24   : > { %v427_v61 = vsel %vm407_vm0, %v424_v51, %v426_v52  ;;  %v514_v62 = vsel %vm496_vm1, %v512_v53, %v513_v54  ;;  %v439_v6 = vrot.slane %v2053_v58, 1  ;;  %v441_v7 = vrot.slane %v373_v59, 1 }
  0x25   : > { %v516_v63 = vsel %vm496_vm1, %v513_v54, %v515_v55  ;;  %v527_v8 = vrot.slane %v2050_v57, 2  ;;  %v2069_v11 = vpack.i.bf16 %v427_v61, %v425_v60  ;;  %v528_v14 = vrot.slane %v2053_v58, 2  ;;  %v2134_v54 = vld [vmem:[%s336_s7 + $0x8] sm:$0xff]  ;;  %v2142_v60 = vld [vmem:[%s336_s7] sm:$0xff] }
  0x26   : > { %1553 = vrot.lane.b32.xlu1 %v2019_v42, %s1882_s27  ;;  %v2071_v13 = vpack.i.bf16 %v516_v63, %v514_v62  ;;  %v530_v15 = vrot.slane %v373_v59, 2  ;;  %v517_v18 = vrot.slane %v2062_v3, 2  ;;  %v440_v19 = vsel %vm407_vm0, %v438_v5, %v439_v6  ;;  %v382_v5 = vld [vmem:[%s336_s7 + $0x10] sm:$0x3] }
  0x27   : > { %1543 = vrot.lane.b32.xlu0 %v1542_v43, %s1883_s28  ;;  %v442_v20 = vsel %vm407_vm0, %v439_v6, %v441_v7  ;;  %v529_v24 = vsel %vm496_vm1, %v527_v8, %v528_v14  ;;  %v443_v28 = vrot.slane %v2075_v16, 1  ;;  %v444_v29 = vrot.slane %v2078_v17, 1 }
  0x28   : > { %v2089_v23 = vpack.i.bf16 %v442_v20, %v440_v19  ;;  %v531_v25 = vsel %vm496_vm1, %v528_v14, %v530_v15  ;;  %v533_v31 = vrot.slane %v2078_v17, 2  ;;  %v535_v32 = vrot.slane %v376_v21, 2 }
  0x29   : > { %v2096_v27 = vpack.i.bf16 %v531_v25, %v529_v24  ;;  %v518_v33 = vrot.slane %v2087_v22, 2  ;;  %v445_v34 = vsel %vm407_vm0, %v443_v28, %v444_v29  ;;  %v520_v38 = vrot.slane %v2094_v26, 2 }
  0x2a   : > { %1563 = vrot.lane.b32.xlu1 %v1542_v43, %s1881_s26  ;;  %v536_v41 = vsel %vm496_vm1, %v533_v31, %v535_v32  ;;  %v636_v45 = vrot.slane %v2107_v35, 1  ;;  %v637_v49 = vrot.slane %v2110_v36, 1  ;;  %v639_v50 = vrot.slane %v379_v37, 1 }
  0x2b   : > { %1548 = vrot.lane.b32.xlu0 %v2033_v48, %s1884_s29  ;;  %v689_v51 = vrot.slane %v2107_v35, 2  ;;  %v690_v52 = vrot.slane %v2110_v36, 2  ;;  %v692_v53 = vrot.slane %v379_v37, 2  ;;  %v1622_v55 = vpack.i.bf16 %v2087_v22, %v2062_v3 }
  0x2c   : > { %v640_v59 = vsel %vm407_vm0, %v637_v49, %v639_v50  ;;  %v519_v6 = vsel %vm496_vm1, %v517_v18, %v518_v33  ;;  %v794_v8 = vrot.slane %v2134_v54, 1  ;;  %v521_v14 = vsel %vm496_vm1, %v518_v33, %v520_v38 }
  0x2d   : > { %v691_v62 = vsel %vm496_vm1, %v689_v51, %v690_v52  ;;  %v693_v63 = vsel %vm496_vm1, %v690_v52, %v692_v53  ;;  %v847_v15 = vrot.slane %v2134_v54, 2  ;;  %v793_v19 = vrot.slane %v2142_v60, 1 }
  0x2e   : > { %1573 = vrot.lane.b32.xlu1 %v2033_v48, %s1880_s25  ;;  %v2151_v7 = vpack.i.bf16 %v693_v63, %v691_v62  ;;  %v846_v20 = vrot.slane %v2142_v60, 2  ;;  %v429_v24 = vrot.slane %v2087_v22, 1  ;;  %v796_v18 = vrot.slane %v382_v5, 1 }
  0x2f   : > { %1558 = vrot.lane.b32.xlu0 %v1537_v30, %s1879_s17  ;;  %v532_v30 = vrot.slane %v2075_v16, 2  ;;  %v849_v25 = vrot.slane %v382_v5, 2  ;;  %v431_v28 = vrot.slane %v2094_v26, 1  ;;  %v1885_v32 = vmov 0.0|0.0  }
  0x30   : > { %1430 = vmatprep.subr.bf16.mxu0 %v1885_v32 }
  0x31   : > { %v534_v40 = vsel %vm496_vm1, %v532_v30, %v533_v31  ;;  %v2171_v30 = vsel %vm407_vm0, %v794_v8, %v796_v18  ;;  %v2174_v31 = vsel %vm496_vm1, %v847_v15, %v849_v25  ;;  %v432_v37 = vsel %vm407_vm0, %v429_v24, %v431_v28 }
  0x32   : > { %1583 = vrot.lane.b32.xlu1 %v2047_v56, %s1878_s16  ;;  %v2126_v44 = vpack.i.bf16 %v536_v41, %v534_v40  ;;  %v2192_v40 = vld [vmem:[%s1958_s9 + $0x68] sm:$0xff]  ;;  %v370_v41 = vld [vmem:[%s1958_s9 + $0x70] sm:$0x3] }
  0x33   : > { %1568 = vrot.lane.b32.xlu0 %v1992_v12, %s1877_s15  ;;  %v446_v12 = vrot.slane %v376_v21, 1  ;;  %v428_v21 = vrot.slane %v2062_v3, 1  ;;  %v434_v53 = vrot.slane %v2192_v40, 1 }
  0x35   : > { %v447_v39 = vsel %vm407_vm0, %v444_v29, %v446_v12  ;;  %v2164_v29 = vsel %vm407_vm0, %v793_v19, %v794_v8  ;;  %v2167_v12 = vsel %vm496_vm1, %v846_v20, %v847_v15  ;;  %v1887_v19 = vmov 0.0  }
  0x36   : > { %1593 = vrot.lane.b32.xlu1 %v2071_v13, %s1882_s27  ;;  %v2124_v43 = vpack.i.bf16 %v447_v39, %v445_v34  ;;  %v1827_v26 = vpack.i.bf16 %v2171_v30, %v2164_v29  ;;  %v1832_v33 = vpack.i.bf16 %v2174_v31, %v2167_v12  ;;  %v430_v34 = vsel %vm407_vm0, %v428_v21, %v429_v24  ;;  %v2189_v39 = vld [vmem:[%s1958_s9 + $0x60] sm:$0xff] }
  0x37   : > { %1578 = vrot.lane.b32.xlu0 %v2019_v42, %s1883_s28  ;;  %v1627_v38 = vpack.i.bf16 %v432_v37, %v430_v34  ;;  %v1662_v50 = vpack.i.bf16 %v2192_v40, %v2189_v39  ;;  %1427 = vmatprep.mubr.msk.f32.mxu0 %vm1886_vm6, %v1887_v19 }
  0x3a   : > { %1603 = vrot.lane.b32.xlu1 %v2019_v42, %s1881_s26  ;;  %v638_v42 = vsel %vm407_vm0, %v636_v45, %v637_v49  ;;  %v523_v45 = vrot.slane %v2192_v40, 2  ;;  %v525_v49 = vrot.slane %v370_v41, 2 }
  0x3b   : > { %1588 = vrot.lane.b32.xlu0 %v2069_v11, %s1884_s29  ;;  %v2144_v61 = vpack.i.bf16 %v640_v59, %v638_v42  ;;  %v436_v42 = vrot.slane %v370_v41, 1 }
  0x3c   : > { %v526_v52 = vsel %vm496_vm1, %v523_v45, %v525_v49 }
  0x3d   : > { %v437_v63 = vsel %vm407_vm0, %v434_v53, %v436_v42 }
  0x3e   : > { %1613 = vrot.lane.b32.xlu1 %v2069_v11, %s1880_s25 }
  0x3f   : > { %1598 = vrot.lane.b32.xlu0 %v2033_v48, %s1879_s17  ;;  %v1632_v48 = vpack.i.bf16 %v521_v14, %v519_v6  ;;  %v1782_v6 = vpack.i.bf16 %v2110_v36, %v2107_v35 }
  0x42   : > { %1623 = vrot.lane.b32.xlu1 %v1622_v55, %s1878_s16 }
  0x43   : > { %1608 = vrot.lane.b32.xlu0 %v2047_v56, %s1877_s15  ;;  %v522_v56 = vrot.slane %v2189_v39, 2 }
  0x45   : > { %v524_v51 = vsel %vm496_vm1, %v522_v56, %v523_v45 }
  0x46   : > { %1633 = vrot.lane.b32.xlu1 %v1632_v48, %s1882_s27  ;;  %v1672_v59 = vpack.i.bf16 %v526_v52, %v524_v51 }
  0x47   : > { %1618 = vrot.lane.b32.xlu0 %v2071_v13, %s1883_s28 }
  0x4a   : > { %1643 = vrot.lane.b32.xlu1 %v2071_v13, %s1881_s26  ;;  %v433_v13 = vrot.slane %v2189_v39, 1 }
  0x4b   : > { %1628 = vrot.lane.b32.xlu0 %v1627_v38, %s1884_s29 }
  0x4c   : > { %v435_v62 = vsel %vm407_vm0, %v433_v13, %v434_v53 }
  0x4d   : > { %v1667_v5 = vpack.i.bf16 %v437_v63, %v435_v62 }
  0x4e   : > { %1653 = vrot.lane.b32.xlu1 %v1627_v38, %s1880_s25 }
  0x4f   : > { %1638 = vrot.lane.b32.xlu0 %v2069_v11, %s1879_s17  ;;  %v1702_v11 = vpack.i.bf16 %v2053_v58, %v2050_v57 }
  0x52   : > { %1663 = vrot.lane.b32.xlu1 %v1662_v50, %s1878_s16 }
  0x53   : > { %1648 = vrot.lane.b32.xlu0 %v1622_v55, %s1877_s15  ;;  %v1742_v55 = vpack.i.bf16 %v2078_v17, %v2075_v16 }
  0x56   : > { %1673 = vrot.lane.b32.xlu1 %v1672_v59, %s1882_s27 }
  0x57   : > { %1658 = vrot.lane.b32.xlu0 %v1632_v48, %s1883_s28 }
  0x5a   : > { %1683 = vrot.lane.b32.xlu1 %v1632_v48, %s1881_s26 }
  0x5b   : > { %1668 = vrot.lane.b32.xlu0 %v1667_v5, %s1884_s29 }
  0x5e   : > { %1693 = vrot.lane.b32.xlu1 %v1667_v5, %s1880_s25 }
  0x5f   : > { %1678 = vrot.lane.b32.xlu0 %v1627_v38, %s1879_s17 }
  0x62   : > { %1703 = vrot.lane.b32.xlu1 %v1702_v11, %s1878_s16 }
  0x63   : > { %1688 = vrot.lane.b32.xlu0 %v1662_v50, %s1877_s15 }
  0x66   : > { %1713 = vrot.lane.b32.xlu1 %v2096_v27, %s1882_s27 }
  0x67   : > { %1698 = vrot.lane.b32.xlu0 %v1672_v59, %s1883_s28 }
  0x6a   : > { %1723 = vrot.lane.b32.xlu1 %v1672_v59, %s1881_s26 }
  0x6b   : > { %1708 = vrot.lane.b32.xlu0 %v2089_v23, %s1884_s29 }
  0x6e   : > { %1733 = vrot.lane.b32.xlu1 %v2089_v23, %s1880_s25 }
  0x6f   : > { %1718 = vrot.lane.b32.xlu0 %v1667_v5, %s1879_s17 }
  0x72   : > { %1743 = vrot.lane.b32.xlu1 %v1742_v55, %s1878_s16 }
  0x73   : > { %1728 = vrot.lane.b32.xlu0 %v1702_v11, %s1877_s15 }
  0x76   : > { %1753 = vrot.lane.b32.xlu1 %v2126_v44, %s1882_s27 }
  0x77   : > { %1738 = vrot.lane.b32.xlu0 %v2096_v27, %s1883_s28 }
  0x7a   : > { %1763 = vrot.lane.b32.xlu1 %v2096_v27, %s1881_s26 }
  0x7b   : > { %1748 = vrot.lane.b32.xlu0 %v2124_v43, %s1884_s29 }
  0x7e   : > { %1773 = vrot.lane.b32.xlu1 %v2124_v43, %s1880_s25 }
  0x7f   : > { %1758 = vrot.lane.b32.xlu0 %v2089_v23, %s1879_s17  ;;  %v1822_v23 = vpack.i.bf16 %v2134_v54, %v2142_v60 }
  0x82   : > { %1783 = vrot.lane.b32.xlu1 %v1782_v6, %s1878_s16 }
  0x83   : > { %1768 = vrot.lane.b32.xlu0 %v1742_v55, %s1877_s15 }
  0x86   : > { %1793 = vrot.lane.b32.xlu1 %v2151_v7, %s1882_s27 }
  0x87   : > { %1778 = vrot.lane.b32.xlu0 %v2126_v44, %s1883_s28 }
  0x8a   : > { %1803 = vrot.lane.b32.xlu1 %v2126_v44, %s1881_s26 }
  0x8b   : > { %1788 = vrot.lane.b32.xlu0 %v2144_v61, %s1884_s29 }
  0x8c   : > { %v1519_v27 = vpop.permute.xlu1 %1518 }
  0x8d   : > { %v1521_v20 = vunpack.i.h.bf16 %v1519_v27  ;;  %v1520_v21 = vunpack.i.l.bf16 %v1519_v27 }
  0x8e   : > { %1813 = vrot.lane.b32.xlu1 %v2144_v61, %s1880_s25  ;;  %s352_s25 = scalar_lea.vmem %s2483_s5, %s1356_s12 }
  0x8f   : > { %1798 = vrot.lane.b32.xlu0 %v2124_v43, %s1879_s17 }
  0x90   : > { %v1524_v35 = vpop.permute.xlu1 %1523 }
  0x91   : > { %v1529_v36 = vpop.permute.xlu0 %1528  ;;  %v1526_v56 = vunpack.i.h.bf16 %v1524_v35  ;;  %v1525_v45 = vunpack.i.l.bf16 %v1524_v35 }
  0x92   : > { %1823 = vrot.lane.b32.xlu1 %v1822_v23, %s1878_s16  ;;  %v1531_v8 = vunpack.i.h.bf16 %v1529_v36  ;;  %v1530_v14 = vunpack.i.l.bf16 %v1529_v36 }
  0x93   : > { %1808 = vrot.lane.b32.xlu0 %v1782_v6, %s1877_s15  ;;  %s344_s15 = scalar_lea.vmem %s2482_s4, %s1356_s12 }
  0x94   : > { %v1539_v44 = vpop.permute.xlu1 %1538  ;;  %v901_v24 = vsel %vm899_vm2, %v1988_v10, %v1531_v8  ;;  %v900_v18 = vsel %vm899_vm2, %v1986_v9, %v1530_v14 }
  0x95   : > { %v1534_v15 = vpop.permute.xlu0 %1533  ;;  %v1541_v60 = vunpack.i.h.bf16 %v1539_v44  ;;  %v1540_v61 = vunpack.i.l.bf16 %v1539_v44 }
  0x96   : > { %1833 = vrot.lane.b32.xlu1 %v1832_v33, %s1882_s27  ;;  %v1536_v43 = vunpack.i.h.bf16 %v1534_v15  ;;  %v1535_v54 = vunpack.i.l.bf16 %v1534_v15 }
  0x97   : > { %1818 = vrot.lane.b32.xlu0 %v2151_v7, %s1883_s28 }
  0x98   : > { %v1554_v25 = vpop.permute.xlu1 %1553  ;;  %v917_v28 = vsel %vm916_vm3, %v900_v18, %v1535_v54  ;;  %v918_v12 = vsel %vm916_vm3, %v901_v24, %v1536_v43 }
  0x99   : > { %v934_v48 = vsel %vm933_vm4, %v917_v28, %v1520_v21  ;;  %v935_v31 = vsel %vm933_vm4, %v918_v12, %v1521_v20  ;;  %v1544_v33 = vpop.permute.xlu0 %1543  ;;  %v1556_v50 = vunpack.i.h.bf16 %v1554_v25  ;;  %v1555_v51 = vunpack.i.l.bf16 %v1554_v25 }
  0x9a   : > { %v951_v34 = vsel %vm950_vm5, %v934_v48, %v1540_v61  ;;  %v952_v10 = vsel %vm950_vm5, %v935_v31, %v1541_v60  ;;  %v1546_v37 = vunpack.i.h.bf16 %v1544_v33  ;;  %v1545_v9 = vunpack.i.l.bf16 %v1544_v33 }
  0x9b   : > { %1828 = vrot.lane.b32.xlu0 %v1827_v26, %s1884_s29 }
  0x9c   : > { %v1564_v7 = vpop.permute.xlu1 %1563  ;;  %v968_v38 = vsel %vm967_vm7, %v951_v34, %v1545_v9  ;;  %v969_v41 = vsel %vm967_vm7, %v952_v10, %v1546_v37 }
  0x9d   : > { %v1549_v49 = vpop.permute.xlu0 %1548  ;;  %v985_v53 = vsel %vm984_vm8, %v968_v38, %v1525_v45  ;;  %v986_v29 = vsel %vm984_vm8, %v969_v41, %v1526_v56  ;;  %v1566_v27 = vunpack.i.h.bf16 %v1564_v7  ;;  %v1565_v23 = vunpack.i.l.bf16 %v1564_v7 }
  0x9e   : > { %v1551_v52 = vunpack.i.h.bf16 %v1549_v49  ;;  %v1550_v13 = vunpack.i.l.bf16 %v1549_v49 }
  0xa0   : > { %v1574_v30 = vpop.permute.xlu1 %1573  ;;  %v1002_v26 = vsel %vm1001_vm9, %v985_v53, %v1550_v13  ;;  %v1003_v42 = vsel %vm1001_vm9, %v986_v29, %v1551_v52 }
  0xa1   : > { %v1559_v59 = vpop.permute.xlu0 %1558  ;;  %v1019_v62 = vsel %vm1018_vm10, %v1002_v26, %v1555_v51  ;;  %v1020_v63 = vsel %vm1018_vm10, %v1003_v42, %v1556_v50  ;;  %v1576_v60 = vunpack.i.h.bf16 %v1574_v30  ;;  %v1575_v61 = vunpack.i.l.bf16 %v1574_v30 }
  0xa2   : > { %v1561_v11 = vunpack.i.h.bf16 %v1559_v59  ;;  %v1560_v55 = vunpack.i.l.bf16 %v1559_v59  ;;  %v1431_v6 = vpack.c.bf16 %v1020_v63, %v1019_v62 }
  0xa4   : > { %v1584_v35 = vpop.permute.xlu1 %1583  ;;  %v903_v36 = vsel %vm899_vm2, %v1964_v1, %v1561_v11  ;;  %v902_v8 = vsel %vm899_vm2, %v1961_v0, %v1560_v55  ;;  %1433 = vmatpush3.bf16.xpose.msk.msra.mxu0 %vm2298_vm12, %v1431_v6 }
  0xa5   : > { %v1569_v14 = vpop.permute.xlu0 %1568  ;;  %1434 = vmatprep.subr.bf16.mxu0 %v1885_v32  ;;  %v919_v43 = vsel %vm916_vm3, %v902_v8, %v1565_v23  ;;  %v920_v54 = vsel %vm916_vm3, %v903_v36, %v1566_v27  ;;  %v1586_v28 = vunpack.i.h.bf16 %v1584_v35  ;;  %v1585_v12 = vunpack.i.l.bf16 %v1584_v35 }
  0xa6   : > { %v1571_v44 = vunpack.i.h.bf16 %v1569_v14  ;;  %v1570_v15 = vunpack.i.l.bf16 %v1569_v14 }
  0xa8   : > { %v1594_v19 = vpop.permute.xlu1 %1593  ;;  %v936_v1 = vsel %vm933_vm4, %v919_v43, %v1570_v15  ;;  %v937_v20 = vsel %vm933_vm4, %v920_v54, %v1571_v44 }
  0xa9   : > { %v1579_v0 = vpop.permute.xlu0 %1578  ;;  %v953_v18 = vsel %vm950_vm5, %v936_v1, %v1575_v61  ;;  %v954_v25 = vsel %vm950_vm5, %v937_v20, %v1576_v60  ;;  %v1596_v10 = vunpack.i.h.bf16 %v1594_v19  ;;  %v1595_v37 = vunpack.i.l.bf16 %v1594_v19 }
  0xaa   : > { %v1581_v21 = vunpack.i.h.bf16 %v1579_v0  ;;  %v1580_v24 = vunpack.i.l.bf16 %v1579_v0 }
  0xac   : > { %v1604_v48 = vpop.permute.xlu1 %1603  ;;  %v970_v31 = vsel %vm967_vm7, %v953_v18, %v1580_v24  ;;  %v971_v33 = vsel %vm967_vm7, %v954_v25, %v1581_v21 }
  0xad   : > { %v1589_v34 = vpop.permute.xlu0 %1588  ;;  %v987_v38 = vsel %vm984_vm8, %v970_v31, %v1585_v12  ;;  %v988_v41 = vsel %vm984_vm8, %v971_v33, %v1586_v28  ;;  %v1606_v30 = vunpack.i.h.bf16 %v1604_v48  ;;  %v1605_v26 = vunpack.i.l.bf16 %v1604_v48 }
  0xae   : > { %v1591_v9 = vunpack.i.h.bf16 %v1589_v34  ;;  %v1590_v7 = vunpack.i.l.bf16 %v1589_v34 }
  0xb0   : > { %v1614_v56 = vpop.permute.xlu1 %1613  ;;  %v1004_v45 = vsel %vm1001_vm9, %v987_v38, %v1590_v7  ;;  %v1005_v49 = vsel %vm1001_vm9, %v988_v41, %v1591_v9 }
  0xb1   : > { %v1021_v50 = vsel %vm1018_vm10, %v1004_v45, %v1595_v37  ;;  %v1022_v51 = vsel %vm1018_vm10, %v1005_v49, %v1596_v10  ;;  %v1599_v52 = vpop.permute.xlu0 %1598  ;;  %v1616_v23 = vunpack.i.h.bf16 %v1614_v56  ;;  %v1615_v35 = vunpack.i.l.bf16 %v1614_v56 }
  0xb2   : > { %v1435_v13 = vpack.c.bf16 %v1022_v51, %v1021_v50  ;;  %v1601_v53 = vunpack.i.h.bf16 %v1599_v52  ;;  %v1600_v29 = vunpack.i.l.bf16 %v1599_v52 }
  0xb4   : > { %v1624_v42 = vpop.permute.xlu1 %1623  ;;  %v905_v59 = vsel %vm899_vm2, %v1975_v4, %v1601_v53  ;;  %v904_v62 = vsel %vm899_vm2, %v1969_v2, %v1600_v29  ;;  %1437 = vmatpush3.bf16.xpose.msk.msra.mxu0 %vm2298_vm12, %v1435_v13 }
  0xb5   : > { %v1609_v63 = vpop.permute.xlu0 %1608  ;;  %1438 = vmatprep.subr.bf16.mxu0 %v1885_v32  ;;  %v921_v6 = vsel %vm916_vm3, %v904_v62, %v1605_v26  ;;  %v922_v27 = vsel %vm916_vm3, %v905_v59, %v1606_v30  ;;  %v1626_v54 = vunpack.i.h.bf16 %v1624_v42  ;;  %v1625_v60 = vunpack.i.l.bf16 %v1624_v42 }
  0xb6   : > { %v1611_v11 = vunpack.i.h.bf16 %v1609_v63  ;;  %v1610_v55 = vunpack.i.l.bf16 %v1609_v63 }
  0xb8   : > { %v1634_v36 = vpop.permute.xlu1 %1633  ;;  %v938_v4 = vsel %vm933_vm4, %v921_v6, %v1610_v55  ;;  %v939_v8 = vsel %vm933_vm4, %v922_v27, %v1611_v11 }
  0xb9   : > { %v1619_v2 = vpop.permute.xlu0 %1618  ;;  %v955_v15 = vsel %vm950_vm5, %v938_v4, %v1615_v35  ;;  %v956_v43 = vsel %vm950_vm5, %v939_v8, %v1616_v23  ;;  %v1636_v0 = vunpack.i.h.bf16 %v1634_v36  ;;  %v1635_v21 = vunpack.i.l.bf16 %v1634_v36 }
  0xba   : > { %v1621_v14 = vunpack.i.h.bf16 %v1619_v2  ;;  %v1620_v44 = vunpack.i.l.bf16 %v1619_v2 }
  0xbc   : > { %v1644_v61 = vpop.permute.xlu1 %1643  ;;  %v972_v19 = vsel %vm967_vm7, %v955_v15, %v1620_v44  ;;  %v973_v1 = vsel %vm967_vm7, %v956_v43, %v1621_v14 }
  0xbd   : > { %v1629_v20 = vpop.permute.xlu0 %1628  ;;  %v989_v25 = vsel %vm984_vm8, %v972_v19, %v1625_v60  ;;  %v990_v28 = vsel %vm984_vm8, %v973_v1, %v1626_v54  ;;  %v1646_v38 = vunpack.i.h.bf16 %v1644_v61  ;;  %v1645_v41 = vunpack.i.l.bf16 %v1644_v61 }
  0xbe   : > { %v1631_v24 = vunpack.i.h.bf16 %v1629_v20  ;;  %v1630_v18 = vunpack.i.l.bf16 %v1629_v20 }
  0xc0   : > { %v1654_v12 = vpop.permute.xlu1 %1653  ;;  %v1006_v48 = vsel %vm1001_vm9, %v989_v25, %v1630_v18  ;;  %v1007_v31 = vsel %vm1001_vm9, %v990_v28, %v1631_v24 }
  0xc1   : > { %v1023_v33 = vsel %vm1018_vm10, %v1006_v48, %v1635_v21  ;;  %v1024_v34 = vsel %vm1018_vm10, %v1007_v31, %v1636_v0  ;;  %v1639_v10 = vpop.permute.xlu0 %1638  ;;  %v1656_v29 = vunpack.i.h.bf16 %v1654_v12  ;;  %v1655_v30 = vunpack.i.l.bf16 %v1654_v12 }
  0xc2   : > { %v1439_v37 = vpack.c.bf16 %v1024_v34, %v1023_v33  ;;  %v1641_v9 = vunpack.i.h.bf16 %v1639_v10  ;;  %v1640_v7 = vunpack.i.l.bf16 %v1639_v10 }
  0xc4   : > { %v1664_v56 = vpop.permute.xlu1 %1663  ;;  %v907_v45 = vsel %vm899_vm2, %v2030_v47, %v1641_v9  ;;  %v906_v49 = vsel %vm899_vm2, %v2027_v46, %v1640_v7  ;;  %1441 = vmatpush3.bf16.xpose.msk.msra.mxu0 %vm2298_vm12, %v1439_v37 }
  0xc5   : > { %v1649_v50 = vpop.permute.xlu0 %1648  ;;  %1442 = vmatprep.subr.bf16.mxu0 %v1885_v32  ;;  %v923_v13 = vsel %vm916_vm3, %v906_v49, %v1645_v41  ;;  %v924_v53 = vsel %vm916_vm3, %v907_v45, %v1646_v38  ;;  %v1666_v55 = vunpack.i.h.bf16 %v1664_v56  ;;  %v1665_v6 = vunpack.i.l.bf16 %v1664_v56 }
  0xc6   : > { %v1651_v51 = vunpack.i.h.bf16 %v1649_v50  ;;  %v1650_v52 = vunpack.i.l.bf16 %v1649_v50 }
  0xc8   : > { %v1674_v26 = vpop.permute.xlu1 %1673  ;;  %v940_v47 = vsel %vm933_vm4, %v923_v13, %v1650_v52  ;;  %v941_v42 = vsel %vm933_vm4, %v924_v53, %v1651_v51 }
  0xc9   : > { %v1659_v46 = vpop.permute.xlu0 %1658  ;;  %v957_v63 = vsel %vm950_vm5, %v940_v47, %v1655_v30  ;;  %v958_v11 = vsel %vm950_vm5, %v941_v42, %v1656_v29  ;;  %v1676_v4 = vunpack.i.h.bf16 %v1674_v26  ;;  %v1675_v8 = vunpack.i.l.bf16 %v1674_v26 }
  0xca   : > { %v1661_v59 = vunpack.i.h.bf16 %v1659_v46  ;;  %v1660_v62 = vunpack.i.l.bf16 %v1659_v46 }
  0xcc   : > { %v1684_v27 = vpop.permute.xlu1 %1683  ;;  %v974_v23 = vsel %vm967_vm7, %v957_v63, %v1660_v62  ;;  %v975_v35 = vsel %vm967_vm7, %v958_v11, %v1661_v59 }
  0xcd   : > { %v1669_v36 = vpop.permute.xlu0 %1668  ;;  %v991_v44 = vsel %vm984_vm8, %v974_v23, %v1665_v6  ;;  %v992_v15 = vsel %vm984_vm8, %v975_v35, %v1666_v55  ;;  %v1686_v24 = vunpack.i.h.bf16 %v1684_v27  ;;  %v1685_v18 = vunpack.i.l.bf16 %v1684_v27 }
  0xce   : > { %v1671_v2 = vunpack.i.h.bf16 %v1669_v36  ;;  %v1670_v14 = vunpack.i.l.bf16 %v1669_v36 }
  0xd0   : > { %v1694_v43 = vpop.permute.xlu1 %1693  ;;  %v1008_v54 = vsel %vm1001_vm9, %v991_v44, %v1670_v14  ;;  %v1009_v60 = vsel %vm1001_vm9, %v992_v15, %v1671_v2 }
  0xd1   : > { %v1025_v61 = vsel %vm1018_vm10, %v1008_v54, %v1675_v8  ;;  %v1026_v19 = vsel %vm1018_vm10, %v1009_v60, %v1676_v4  ;;  %v1679_v1 = vpop.permute.xlu0 %1678  ;;  %v1696_v37 = vunpack.i.h.bf16 %v1694_v43  ;;  %v1695_v9 = vunpack.i.l.bf16 %v1694_v43 }
  0xd2   : > { %v1443_v20 = vpack.c.bf16 %v1026_v19, %v1025_v61  ;;  %v1681_v0 = vunpack.i.h.bf16 %v1679_v1  ;;  %v1680_v21 = vunpack.i.l.bf16 %v1679_v1 }
  0xd4   : > { %v1704_v25 = vpop.permute.xlu1 %1703  ;;  %v909_v28 = vsel %vm899_vm2, %v2087_v22, %v1681_v0  ;;  %v908_v12 = vsel %vm899_vm2, %v2062_v3, %v1680_v21  ;;  %1445 = vmatpush3.bf16.xpose.msk.msra.mxu0 %vm2298_vm12, %v1443_v20 }
  0xd5   : > { %v1689_v48 = vpop.permute.xlu0 %1688  ;;  %1446 = vmatprep.subr.bf16.mxu0 %v1885_v32  ;;  %v925_v34 = vsel %vm916_vm3, %v908_v12, %v1685_v18  ;;  %v926_v10 = vsel %vm916_vm3, %v909_v28, %v1686_v24  ;;  %v1706_v50 = vunpack.i.h.bf16 %v1704_v25  ;;  %v1705_v51 = vunpack.i.l.bf16 %v1704_v25 }
  0xd6   : > { %v1691_v31 = vunpack.i.h.bf16 %v1689_v48  ;;  %v1690_v33 = vunpack.i.l.bf16 %v1689_v48 }
  0xd8   : > { %v1714_v7 = vpop.permute.xlu1 %1713  ;;  %v942_v22 = vsel %vm933_vm4, %v925_v34, %v1690_v33  ;;  %v943_v38 = vsel %vm933_vm4, %v926_v10, %v1691_v31 }
  0xd9   : > { %v1699_v3 = vpop.permute.xlu0 %1698  ;;  %v959_v45 = vsel %vm950_vm5, %v942_v22, %v1695_v9  ;;  %v960_v49 = vsel %vm950_vm5, %v943_v38, %v1696_v37  ;;  %v1716_v30 = vunpack.i.h.bf16 %v1714_v7  ;;  %v1715_v26 = vunpack.i.l.bf16 %v1714_v7 }
  0xda   : > { %v1701_v41 = vunpack.i.h.bf16 %v1699_v3  ;;  %v1700_v56 = vunpack.i.l.bf16 %v1699_v3 }
  0xdc   : > { %v1724_v52 = vpop.permute.xlu1 %1723  ;;  %v976_v13 = vsel %vm967_vm7, %v959_v45, %v1700_v56  ;;  %v977_v53 = vsel %vm967_vm7, %v960_v49, %v1701_v41 }
  0xdd   : > { %v1709_v29 = vpop.permute.xlu0 %1708  ;;  %v993_v46 = vsel %vm984_vm8, %v976_v13, %v1705_v51  ;;  %v994_v59 = vsel %vm984_vm8, %v977_v53, %v1706_v50  ;;  %v1726_v4 = vunpack.i.h.bf16 %v1724_v52  ;;  %v1725_v8 = vunpack.i.l.bf16 %v1724_v52 }
  0xde   : > { %v1711_v47 = vunpack.i.h.bf16 %v1709_v29  ;;  %v1710_v42 = vunpack.i.l.bf16 %v1709_v29 }
  0xe0   : > { %v1734_v62 = vpop.permute.xlu1 %1733  ;;  %v1010_v63 = vsel %vm1001_vm9, %v993_v46, %v1710_v42  ;;  %v1011_v11 = vsel %vm1001_vm9, %v994_v59, %v1711_v47 }
  0xe1   : > { %v1027_v55 = vsel %vm1018_vm10, %v1010_v63, %v1715_v26  ;;  %v1028_v6 = vsel %vm1018_vm10, %v1011_v11, %v1716_v30  ;;  %v1719_v27 = vpop.permute.xlu0 %1718  ;;  %v1736_v19 = vunpack.i.h.bf16 %v1734_v62  ;;  %v1735_v1 = vunpack.i.l.bf16 %v1734_v62 }
  0xe2   : > { %v1447_v23 = vpack.c.bf16 %v1028_v6, %v1027_v55  ;;  %v1721_v35 = vunpack.i.h.bf16 %v1719_v27  ;;  %v1720_v36 = vunpack.i.l.bf16 %v1719_v27 }
  0xe4   : > { %v1744_v2 = vpop.permute.xlu1 %1743  ;;  %v911_v14 = vsel %vm899_vm2, %v2192_v40, %v1721_v35  ;;  %v910_v44 = vsel %vm899_vm2, %v2189_v39, %v1720_v36  ;;  %1449 = vmatpush3.bf16.xpose.msk.msra.mxu0 %vm2298_vm12, %v1447_v23 }
  0xe5   : > { %v1729_v15 = vpop.permute.xlu0 %1728  ;;  %1450 = vmatprep.subr.bf16.mxu0 %v1885_v32  ;;  %v927_v60 = vsel %vm916_vm3, %v910_v44, %v1725_v8  ;;  %v928_v61 = vsel %vm916_vm3, %v911_v14, %v1726_v4  ;;  %v1746_v28 = vunpack.i.h.bf16 %v1744_v2  ;;  %v1745_v12 = vunpack.i.l.bf16 %v1744_v2 }
  0xe6   : > { %v1731_v43 = vunpack.i.h.bf16 %v1729_v15  ;;  %v1730_v54 = vunpack.i.l.bf16 %v1729_v15 }
  0xe8   : > { %v1754_v20 = vpop.permute.xlu1 %1753  ;;  %v944_v40 = vsel %vm933_vm4, %v927_v60, %v1730_v54  ;;  %v945_v0 = vsel %vm933_vm4, %v928_v61, %v1731_v43 }
  0xe9   : > { %v1739_v39 = vpop.permute.xlu0 %1738  ;;  %v961_v18 = vsel %vm950_vm5, %v944_v40, %v1735_v1  ;;  %v962_v25 = vsel %vm950_vm5, %v945_v0, %v1736_v19  ;;  %v1756_v10 = vunpack.i.h.bf16 %v1754_v20  ;;  %v1755_v37 = vunpack.i.l.bf16 %v1754_v20 }
  0xea   : > { %v1741_v21 = vunpack.i.h.bf16 %v1739_v39  ;;  %v1740_v24 = vunpack.i.l.bf16 %v1739_v39 }
  0xec   : > { %v1764_v48 = vpop.permute.xlu1 %1763  ;;  %v978_v31 = vsel %vm967_vm7, %v961_v18, %v1740_v24  ;;  %v979_v33 = vsel %vm967_vm7, %v962_v25, %v1741_v21 }
  0xed   : > { %v1749_v34 = vpop.permute.xlu0 %1748  ;;  %v995_v22 = vsel %vm984_vm8, %v978_v31, %v1745_v12  ;;  %v996_v38 = vsel %vm984_vm8, %v979_v33, %v1746_v28  ;;  %v1766_v53 = vunpack.i.h.bf16 %v1764_v48  ;;  %v1765_v29 = vunpack.i.l.bf16 %v1764_v48 }
  0xee   : > { %v1751_v9 = vunpack.i.h.bf16 %v1749_v34  ;;  %v1750_v7 = vunpack.i.l.bf16 %v1749_v34 }
  0xf0   : > { %v1774_v3 = vpop.permute.xlu1 %1773  ;;  %v1012_v41 = vsel %vm1001_vm9, %v995_v22, %v1750_v7  ;;  %v1013_v56 = vsel %vm1001_vm9, %v996_v38, %v1751_v9 }
  0xf1   : > { %v1029_v45 = vsel %vm1018_vm10, %v1012_v41, %v1755_v37  ;;  %v1030_v49 = vsel %vm1018_vm10, %v1013_v56, %v1756_v10  ;;  %v1759_v50 = vpop.permute.xlu0 %1758  ;;  %v1776_v11 = vunpack.i.h.bf16 %v1774_v3  ;;  %v1775_v55 = vunpack.i.l.bf16 %v1774_v3 }
  0xf2   : > { %v1451_v51 = vpack.c.bf16 %v1030_v49, %v1029_v45  ;;  %v1761_v52 = vunpack.i.h.bf16 %v1759_v50  ;;  %v1760_v13 = vunpack.i.l.bf16 %v1759_v50 }
  0xf4   : > { %v1784_v30 = vpop.permute.xlu1 %1783  ;;  %v913_v26 = vsel %vm899_vm2, %v2053_v58, %v1761_v52  ;;  %v912_v47 = vsel %vm899_vm2, %v2050_v57, %v1760_v13  ;;  %1453 = vmatpush3.bf16.xpose.msk.msra.mxu0 %vm2298_vm12, %v1451_v51 }
  0xf5   : > { %v1769_v42 = vpop.permute.xlu0 %1768  ;;  %1454 = vmatprep.subr.bf16.mxu0 %v1885_v32  ;;  %v929_v62 = vsel %vm916_vm3, %v912_v47, %v1765_v29  ;;  %v930_v63 = vsel %vm916_vm3, %v913_v26, %v1766_v53  ;;  %v1786_v8 = vunpack.i.h.bf16 %v1784_v30  ;;  %v1785_v2 = vunpack.i.l.bf16 %v1784_v30 }
  0xf6   : > { %v1771_v46 = vunpack.i.h.bf16 %v1769_v42  ;;  %v1770_v59 = vunpack.i.l.bf16 %v1769_v42 }
  0xf8   : > { %v1794_v6 = vpop.permute.xlu1 %1793  ;;  %v946_v58 = vsel %vm933_vm4, %v929_v62, %v1770_v59  ;;  %v947_v27 = vsel %vm933_vm4, %v930_v63, %v1771_v46 }
  0xf9   : > { %v1779_v57 = vpop.permute.xlu0 %1778  ;;  %v963_v36 = vsel %vm950_vm5, %v946_v58, %v1775_v55  ;;  %v964_v4 = vsel %vm950_vm5, %v947_v27, %v1776_v11  ;;  %v1796_v54 = vunpack.i.h.bf16 %v1794_v6  ;;  %v1795_v60 = vunpack.i.l.bf16 %v1794_v6  ;;  %v1035_v27 = vld [vmem:[%s2481_s3] sm:$0xff] }
  0xfa   : > { %v1781_v23 = vunpack.i.h.bf16 %v1779_v57  ;;  %v1780_v35 = vunpack.i.l.bf16 %v1779_v57 }
  0xfc   : > { %v1804_v14 = vpop.permute.xlu1 %1803  ;;  %v980_v44 = vsel %vm967_vm7, %v963_v36, %v1780_v35  ;;  %v981_v15 = vsel %vm967_vm7, %v964_v4, %v1781_v23 }
  0xfd   : > { %v1789_v43 = vpop.permute.xlu0 %1788  ;;  %v997_v1 = vsel %vm984_vm8, %v980_v44, %v1785_v2  ;;  %v998_v20 = vsel %vm984_vm8, %v981_v15, %v1786_v8  ;;  %v1806_v48 = vunpack.i.h.bf16 %v1804_v14  ;;  %v1805_v31 = vunpack.i.l.bf16 %v1804_v14 }
  0xfe   : > { %v1791_v61 = vunpack.i.h.bf16 %v1789_v43  ;;  %v1790_v19 = vunpack.i.l.bf16 %v1789_v43 }
 0x100   : > { %v1814_v40 = vpop.permute.xlu1 %1813  ;;  %v1014_v0 = vsel %vm1001_vm9, %v997_v1, %v1790_v19  ;;  %v1015_v39 = vsel %vm1001_vm9, %v998_v20, %v1791_v61 }
 0x101   : > { %v1031_v21 = vsel %vm1018_vm10, %v1014_v0, %v1795_v60  ;;  %v1032_v24 = vsel %vm1018_vm10, %v1015_v39, %v1796_v54  ;;  %v1799_v18 = vpop.permute.xlu0 %1798  ;;  %v1816_v3 = vunpack.i.h.bf16 %v1814_v40  ;;  %v1815_v41 = vunpack.i.l.bf16 %v1814_v40 }
 0x102   : > { %v1455_v25 = vpack.c.bf16 %v1032_v24, %v1031_v21  ;;  %v1801_v28 = vunpack.i.h.bf16 %v1799_v18  ;;  %v1800_v12 = vunpack.i.l.bf16 %v1799_v18 }
 0x104   : > { %v915_v33 = vsel %vm899_vm2, %v2078_v17, %v1801_v28  ;;  %v914_v34 = vsel %vm899_vm2, %v2075_v16, %v1800_v12  ;;  %1457 = vmatpush3.bf16.xpose.msk.msra.mxu0 %vm2298_vm12, %v1455_v25  ;;  %v1824_v10 = vpop.permute.xlu1 %1823 }
 0x105   : > { %v1809_v37 = vpop.permute.xlu0 %1808  ;;  %1458 = vmatprep.subr.bf16.mxu0 %v1885_v32  ;;  %v931_v22 = vsel %vm916_vm3, %v914_v34, %v1805_v31  ;;  %v932_v38 = vsel %vm916_vm3, %v915_v33, %v1806_v48  ;;  %v1826_v52 = vunpack.i.h.bf16 %v1824_v10  ;;  %v1825_v13 = vunpack.i.l.bf16 %v1824_v10 }
 0x106   : > { %v1811_v9 = vunpack.i.h.bf16 %v1809_v37  ;;  %v1810_v7 = vunpack.i.l.bf16 %v1809_v37 }
 0x108   : > { %v948_v17 = vsel %vm933_vm4, %v931_v22, %v1810_v7  ;;  %v949_v56 = vsel %vm933_vm4, %v932_v38, %v1811_v9  ;;  %v1834_v50 = vpop.permute.xlu1 %1833 }
 0x109   : > { %v1819_v16 = vpop.permute.xlu0 %1818  ;;  %v965_v51 = vsel %vm950_vm5, %v948_v17, %v1815_v41  ;;  %v966_v32 = vsel %vm950_vm5, %v949_v56, %v1816_v3  ;;  %v1836_v26 = vunpack.i.h.bf16 %v1834_v50  ;;  %v1835_v47 = vunpack.i.l.bf16 %v1834_v50 }
 0x10a   : > { %v1821_v45 = vunpack.i.h.bf16 %v1819_v16  ;;  %v1820_v49 = vunpack.i.l.bf16 %v1819_v16 }
 0x10c   : > { %v982_v53 = vsel %vm967_vm7, %v965_v51, %v1820_v49  ;;  %v983_v29 = vsel %vm967_vm7, %v966_v32, %v1821_v45 }
 0x10d   : > { %v1829_v30 = vpop.permute.xlu0 %1828  ;;  %v999_v59 = vsel %vm984_vm8, %v982_v53, %v1825_v13  ;;  %v1000_v62 = vsel %vm984_vm8, %v983_v29, %v1826_v52 }
 0x10e   : > { %v1831_v42 = vunpack.i.h.bf16 %v1829_v30  ;;  %v1830_v46 = vunpack.i.l.bf16 %v1829_v30 }
 0x110   : > { %v1016_v63 = vsel %vm1001_vm9, %v999_v59, %v1830_v46  ;;  %v1017_v11 = vsel %vm1001_vm9, %v1000_v62, %v1831_v42 }
 0x111   : > { %v1033_v55 = vsel %vm1018_vm10, %v1016_v63, %v1835_v47  ;;  %v1034_v6 = vsel %vm1018_vm10, %v1017_v11, %v1836_v26 }
 0x112   : > { %v1459_v58 = vpack.c.bf16 %v1034_v6, %v1033_v55 }
 0x114   : > { %1461 = vmatpush3.bf16.xpose.msk.msra.mxu0 %vm2298_vm12, %v1459_v58 }
 0x11b   : > { %1428 = vmatmul.mubr.msk.f32.vlgmr.msra.gmra.mrb[0].mxu0 %vm1036_vm11, %v1035_v27 }
 0x1ee   : > { %v1154_v57 = vpop.f32.mrb[0].mxu0 }
 0x1ef   : > { %1158 = vadd.xlane.f32.xlu0 %v1154_v57  ;;  %v1429_v23 = vpop.f32.mrb[1].mxu0 }
 0x27c   : > { %v1159_v35 = vpop.xlane.xlu0 %1158 }
 0x27d   : > { %v1160_v5 = vmul.f32 0.0078125, %v1159_v35  ;;  %1163 = vst.msk [vmem:[%s344_s15] sm:$0xff] %vm1162_vm13, %v1159_v35 }
 0x27f   : > { %v1161_v36 = vsub.f32 %v1154_v57, %v1160_v5 }
 0x281   : > { %v1164_v4 = vmul.f32 %v1161_v36, %v1161_v36 }
 0x283   : > { %1165 = vadd.xlane.f32.xlu1 %v1164_v4 }
 0x310   : > { %v1166_v8 = vpop.xlane.xlu1 %1165 }
 0x311   : > { %1167 = vst.msk [vmem:[%s352_s25] sm:$0xff] %vm1162_vm13, %v1166_v8 }
 0x312 PF: > { %s16_s22 = sadd.s32 1, %s1875_s22   ;;  %s2486_s18 = smov %s1867_s20 }
 0x313   : > { %p13_p8 = scmp.ge.s32.totalorder %s16_s22, 6   ;;  %s2487_s19 = smov %s1871_s21 }
 0x314   : > { %s2488_s20 = smov %s2491_s23  ;;  %s2489_s21 = smov %s2495_s24 }
 0x315   :  { %15 = sbr.rel (!%p13_p8) target bundleno = 3 (0x3), region = 84 }

// kernel: unit_forward.3
= control target key start
LH: loop header
LB: loop body
LE: loop exit
PB: predicated region body
PF: predicated region fallthrough
CT: control target
= control target key end

     0   :  { %s1890_s21 = smov 0   ;;  %s1892_s22 = smov 0   ;;  %s2453_s0 = inlined_call_operand.vmem [shape: f32[2,2,1,18,4], index: 0, kind: input, shape index: {}]   ;;  %s2454_s1 = inlined_call_operand.vmem [shape: f32[2,16,18,4], index: 1, kind: input, shape index: {}]   ;;  %s2455_s2 = inlined_call_operand.vmem [shape: f32[2,2,1,18,4], index: 2, kind: input, shape index: {}]   ;;  %s2456_s3 = inlined_call_operand.vmem [shape: f32[8,36], index: 3, kind: input, shape index: {}]   ;;  %s2457_s4 = inlined_call_operand.vmem [shape: f32[8,1], index: 4, kind: input, shape index: {}]   ;;  %s2458_s5 = inlined_call_operand.vmem [shape: f32[8,1], index: 5, kind: input, shape index: {}]   ;;  %s2459_s6 = inlined_call_operand.vmem [shape: f32[2,8,256], index: 6, kind: output, shape index: {}]  }
   0x1   :  { %s1894_s23 = smov 0   ;;  %s1896_s24 = smov 0  }
   0x2   :  { %s1898_s25 = smov 0  }
   0x3 LB: > { %s25_s26 = sadd.s32 1, %s1833_s23  ;;  %s28_s27 = sadd.s32 1, %s1837_s24  ;;  %s1841_s25 = sphi %s1898_s25, %s16_s25   ;;  %s1837_s24 = sphi %s1896_s24, %s2465_s24   ;;  %s1833_s23 = sphi %s1894_s23, %s2464_s23   ;;  %s1829_s22 = sphi %s1892_s22, %s2463_s22   ;;  %s1825_s21 = sphi %s1890_s21, %s2462_s21  }
   0x4   : > { %p26_p0 = scmp.ge.s32.totalorder %s25_s26, 2  ;;  %p1315_p1 = scmp.ge.s32.totalorder %s1841_s25, 1 }
   0x5   : > { %p266_p2 = scmp.lt.s32.totalorder %s1841_s25, 5 }
   0x6   : > { %s2467_s26 = smov (%p26_p0, %s25_s26), 0  ;;  %s2469_s27 = smov (!%p26_p0, %s28_s27), %s1837_s24 }
   0x7   : > { %p267_p3 = pnand %p1315_p1, %p266_p2  ;;  %p30_p4 = scmp.ge.s32.totalorder %s2469_s27, 2 }
   0x8   : > { %p322_p5 = scmp.lt.s32.totalorder (!%p267_p3), %s1829_s22, 1  ;;  %s1317_s28 = sshll.u32 (!%p267_p3), %s1825_s21, 3  ;;  %vm413_vm0 = vcmask (!%p267_p3), 1046528   ;;  %vm502_vm1 = vcmask (!%p267_p3), 1045504   ;;  %vm905_vm2 = vcmask (!%p267_p3), 31744   ;;  %vm922_vm3 = vcmask (!%p267_p3), 64512  }
   0x9   : > { %s2471_s27 = smov (%p30_p4, %s2469_s27), 0  ;;  %270 = sbr.rel (%p267_p3) target bundleno = 502 (0x1f6), region = 44 }
   0xa   : > { %p334_p6 = scmp.lt.s32.totalorder (!%p267_p3), %s1317_s28, 15  ;;  %p324_p7 = scmp.lt.s32.totalorder (!%p267_p3), %s1825_s21, 1  ;;  %vm939_vm4 = vcmask (!%p267_p3), 97280   ;;  %vm956_vm5 = vcmask (!%p267_p3), 130048   ;;  %vm1852_vm6 = vmmov (!%p267_p3), 0   ;;  %vm973_vm7 = vcmask (!%p267_p3), 162816  }
   0xb   : > { %s1843_s19 = smov (!%p267_p3), 12   ;;  %s1844_s20 = smov (!%p267_p3), 24   ;;  %vm990_vm8 = vcmask (!%p267_p3), 195584   ;;  %vm1007_vm9 = vcmask (!%p267_p3), 228352   ;;  %vm1024_vm10 = vcmask (!%p267_p3), 261120   ;;  %vm1042_vm11 = vcmask (!%p267_p3), 293888  }
   0xc   : > { %vm2276_vm12 = vmpackc.low (!%p267_p3), %vm1042_vm11, %vm1042_vm11 }
  0x10   : > { %s2473_s22 = smov (!%p322_p5, %s1829_s22), 1  ;;  %s2475_s28 = smov (!%p334_p6, %s1317_s28), 15 }
  0x11   : > { %s1428_s29 = smul.u32 48, %s2473_s22  ;;  %s2477_s21 = smov (!%p324_p7, %s1825_s21), 1 }
  0x12   : > { %s1427_s30 = smul.u32 3, %s2475_s28  ;;  %s1845_s28 = smov 4  }
  0x13   : > { %s1426_s8 = smul.u32 6, %s2473_s22 }
  0x14   : > { %s338_s7 = sadd.s32 %s1428_s29, %s1427_s30  ;;  %s1425_s10 = smul.u32 3, %s2477_s21 }
  0x15   : > { %s1318_s9 = sshll.u32 %s338_s7, 3  ;;  %s1846_s29 = smov 16  }
  0x16   : > { %s1930_s13 = scalar_lea.vmem %s2454_s1, %s1318_s9  ;;  %s1938_s14 = sadd.s32 %s1426_s8, %s1425_s10 }
  0x17   : > { %v1933_v0 = vld [vmem:[%s1930_s13] sm:$0xff]  ;;  %v1936_v1 = vld [vmem:[%s1930_s13 + $0x8] sm:$0xff]  ;;  %v1941_v2 = vld [vmem:[%s1930_s13 + $0x18] sm:$0xff]  ;;  %s1316_s15 = sshll.u32 %s1938_s14, 3  ;;  %s1847_s30 = smov 8  }
  0x18   : > { %v1481_v3 = vpack.i.bf16 %v1936_v1, %v1933_v0  ;;  %v1947_v4 = vld [vmem:[%s1930_s13 + $0x20] sm:$0xff]  ;;  %v364_v5 = vld [vmem:[%s1930_s13 + $0x10] sm:$0x3]  ;;  %v419_v6 = vrot.slane %v1933_v0, 1  ;;  %v420_v7 = vrot.slane %v1936_v1, 1  ;;  %s330_s18 = scalar_lea.vmem %s2453_s0, %s1316_s15  ;;  %v508_v14 = vrot.slane %v1933_v0, 2  ;;  %s350_s12 = scalar_lea.vmem %s2455_s2, %s1316_s15 }
  0x19   : > { %v422_v8 = vrot.slane %v364_v5, 1  ;;  %v1958_v9 = vld [vmem:[%s330_s18] sm:$0xff]  ;;  %v1960_v10 = vld [vmem:[%s330_s18 + $0x8] sm:$0xff]  ;;  %v361_v11 = vld [vmem:[%s330_s18 + $0x10] sm:$0x3]  ;;  %v1964_v12 = vpack.i.bf16 %v1947_v4, %v1941_v2  ;;  %v509_v15 = vrot.slane %v1936_v1, 2 }
  0x1a   : > { %1482 = vrot.lane.b32.xlu1 %v1481_v3, %s1843_s19  ;;  %v421_v13 = vsel %vm413_vm0, %v419_v6, %v420_v7  ;;  %v414_v16 = vrot.slane %v1958_v9, 1  ;;  %v415_v17 = vrot.slane %v1960_v10, 1  ;;  %v417_v18 = vrot.slane %v361_v11, 1  ;;  %v367_v26 = vld [vmem:[%s1930_s13 + $0x28] sm:$0x3]  ;;  %s1848_s7 = smov 32  }
  0x1b   : > { %v506_v19 = vrot.slane %v361_v11, 2  ;;  %v503_v20 = vrot.slane %v1958_v9, 2  ;;  %v504_v21 = vrot.slane %v1960_v10, 2  ;;  %v423_v22 = vsel %vm413_vm0, %v420_v7, %v422_v8  ;;  %v1999_v46 = vld [vmem:[%s1930_s13 + $0x30] sm:$0xff]  ;;  %v2002_v47 = vld [vmem:[%s1930_s13 + $0x38] sm:$0xff]  ;;  %s1849_s8 = smov 20  }
  0x1c   : > { %v416_v23 = vsel %vm413_vm0, %v414_v16, %v415_v17  ;;  %v418_v24 = vsel %vm413_vm0, %v415_v17, %v417_v18  ;;  %v511_v25 = vrot.slane %v364_v5, 2  ;;  %v1501_v30 = vpack.i.bf16 %v423_v22, %v421_v13  ;;  %v370_v49 = vld [vmem:[%s1930_s13 + $0x40] sm:$0x3]  ;;  %s1850_s9 = smov 28   ;;  %v2022_v57 = vld [vmem:[%s1930_s13 + $0x78] sm:$0xff]  ;;  %v2034_v3 = vld [vmem:[%s1930_s13 + $0x48] sm:$0xff] }
  0x1d   : > { %v1491_v27 = vpack.i.bf16 %v418_v24, %v416_v23  ;;  %v505_v28 = vsel %vm502_vm1, %v503_v20, %v504_v21  ;;  %v507_v29 = vsel %vm502_vm1, %v504_v21, %v506_v19  ;;  %v510_v31 = vsel %vm502_vm1, %v508_v14, %v509_v15  ;;  %v2025_v58 = vld [vmem:[%s1930_s13 + $0x80] sm:$0xff]  ;;  %v379_v59 = vld [vmem:[%s1930_s13 + $0x88] sm:$0x3]  ;;  %v2047_v16 = vld [vmem:[%s1930_s13 + $0x90] sm:$0xff] }
  0x1e   : > { %1487 = vrot.lane.b32.xlu1 %v1964_v12, %s1844_s20  ;;  %v1496_v32 = vpack.i.bf16 %v507_v29, %v505_v28  ;;  %v513_v33 = vrot.slane %v1941_v2, 2  ;;  %v514_v34 = vrot.slane %v1947_v4, 2  ;;  %v516_v35 = vrot.slane %v367_v26, 2  ;;  %v2050_v17 = vld [vmem:[%s1930_s13 + $0x98] sm:$0xff]  ;;  %v382_v21 = vld [vmem:[%s1930_s13 + $0xa0] sm:$0x3] }
  0x1f   : > { %1492 = vrot.lane.b32.xlu0 %v1491_v27, %s1845_s28  ;;  %v512_v36 = vsel %vm502_vm1, %v509_v15, %v511_v25  ;;  %v424_v37 = vrot.slane %v1941_v2, 1  ;;  %v425_v38 = vrot.slane %v1947_v4, 1  ;;  %v427_v39 = vrot.slane %v367_v26, 1  ;;  %v2059_v22 = vld [vmem:[%s1930_s13 + $0x50] sm:$0xff]  ;;  %v2066_v26 = vld [vmem:[%s1930_s13 + $0x58] sm:$0x3] }
  0x20   : > { %v515_v40 = vsel %vm502_vm1, %v513_v33, %v514_v34  ;;  %v517_v41 = vsel %vm502_vm1, %v514_v34, %v516_v35  ;;  %v1506_v43 = vpack.i.bf16 %v512_v36, %v510_v31  ;;  %v429_v50 = vrot.slane %v1999_v46, 1  ;;  %v2079_v35 = vld [vmem:[%s1930_s13 + $0xa8] sm:$0xff]  ;;  %v2082_v36 = vld [vmem:[%s1930_s13 + $0xb0] sm:$0xff] }
  0x21   : > { %v1991_v42 = vpack.i.bf16 %v517_v41, %v515_v40  ;;  %v426_v44 = vsel %vm413_vm0, %v424_v37, %v425_v38  ;;  %v428_v45 = vsel %vm413_vm0, %v425_v38, %v427_v39  ;;  %v430_v51 = vrot.slane %v2002_v47, 1  ;;  %v385_v37 = vld [vmem:[%s1930_s13 + $0xb8] sm:$0x3] }
  0x22   : > { %1502 = vrot.lane.b32.xlu1 %v1501_v30, %s1846_s29  ;;  %v2005_v48 = vpack.i.bf16 %v428_v45, %v426_v44  ;;  %v432_v52 = vrot.slane %v370_v49, 1  ;;  %v518_v53 = vrot.slane %v1999_v46, 2  ;;  %v519_v54 = vrot.slane %v2002_v47, 2 }
  0x23   : > { %1497 = vrot.lane.b32.xlu0 %v1496_v32, %s1847_s30  ;;  %v521_v55 = vrot.slane %v370_v49, 2  ;;  %v2019_v56 = vpack.i.bf16 %v2002_v47, %v1999_v46  ;;  %v431_v60 = vsel %vm413_vm0, %v429_v50, %v430_v51  ;;  %v444_v5 = vrot.slane %v2022_v57, 1 }
  0x24   : > { %v433_v61 = vsel %vm413_vm0, %v430_v51, %v432_v52  ;;  %v520_v62 = vsel %vm502_vm1, %v518_v53, %v519_v54  ;;  %v445_v6 = vrot.slane %v2025_v58, 1  ;;  %v447_v7 = vrot.slane %v379_v59, 1 }
  0x25   : > { %v522_v63 = vsel %vm502_vm1, %v519_v54, %v521_v55  ;;  %v533_v8 = vrot.slane %v2022_v57, 2  ;;  %v2041_v11 = vpack.i.bf16 %v433_v61, %v431_v60  ;;  %v534_v14 = vrot.slane %v2025_v58, 2  ;;  %v2106_v54 = vld [vmem:[%s350_s12 + $0x8] sm:$0xff]  ;;  %v2114_v60 = vld [vmem:[%s350_s12] sm:$0xff] }
  0x26   : > { %1517 = vrot.lane.b32.xlu1 %v1991_v42, %s1848_s7  ;;  %v2043_v13 = vpack.i.bf16 %v522_v63, %v520_v62  ;;  %v536_v15 = vrot.slane %v379_v59, 2  ;;  %v523_v18 = vrot.slane %v2034_v3, 2  ;;  %v446_v19 = vsel %vm413_vm0, %v444_v5, %v445_v6  ;;  %v388_v5 = vld [vmem:[%s350_s12 + $0x10] sm:$0x3] }
  0x27   : > { %1507 = vrot.lane.b32.xlu0 %v1506_v43, %s1849_s8  ;;  %v448_v20 = vsel %vm413_vm0, %v445_v6, %v447_v7  ;;  %v535_v24 = vsel %vm502_vm1, %v533_v8, %v534_v14  ;;  %v449_v28 = vrot.slane %v2047_v16, 1  ;;  %v450_v29 = vrot.slane %v2050_v17, 1 }
  0x28   : > { %v2061_v23 = vpack.i.bf16 %v448_v20, %v446_v19  ;;  %v537_v25 = vsel %vm502_vm1, %v534_v14, %v536_v15  ;;  %v539_v31 = vrot.slane %v2050_v17, 2  ;;  %v541_v32 = vrot.slane %v382_v21, 2 }
  0x29   : > { %v2068_v27 = vpack.i.bf16 %v537_v25, %v535_v24  ;;  %v524_v33 = vrot.slane %v2059_v22, 2  ;;  %v451_v34 = vsel %vm413_vm0, %v449_v28, %v450_v29  ;;  %v526_v38 = vrot.slane %v2066_v26, 2 }
  0x2a   : > { %1527 = vrot.lane.b32.xlu1 %v1506_v43, %s1847_s30  ;;  %v542_v41 = vsel %vm502_vm1, %v539_v31, %v541_v32  ;;  %v642_v45 = vrot.slane %v2079_v35, 1  ;;  %v643_v49 = vrot.slane %v2082_v36, 1  ;;  %v645_v50 = vrot.slane %v385_v37, 1 }
  0x2b   : > { %1512 = vrot.lane.b32.xlu0 %v2005_v48, %s1850_s9  ;;  %v695_v51 = vrot.slane %v2079_v35, 2  ;;  %v696_v52 = vrot.slane %v2082_v36, 2  ;;  %v698_v53 = vrot.slane %v385_v37, 2  ;;  %v1586_v55 = vpack.i.bf16 %v2059_v22, %v2034_v3 }
  0x2c   : > { %v646_v59 = vsel %vm413_vm0, %v643_v49, %v645_v50  ;;  %v525_v6 = vsel %vm502_vm1, %v523_v18, %v524_v33  ;;  %v800_v8 = vrot.slane %v2106_v54, 1  ;;  %v527_v14 = vsel %vm502_vm1, %v524_v33, %v526_v38 }
  0x2d   : > { %v697_v62 = vsel %vm502_vm1, %v695_v51, %v696_v52  ;;  %v699_v63 = vsel %vm502_vm1, %v696_v52, %v698_v53  ;;  %v853_v15 = vrot.slane %v2106_v54, 2  ;;  %v799_v19 = vrot.slane %v2114_v60, 1 }
  0x2e   : > { %1537 = vrot.lane.b32.xlu1 %v2005_v48, %s1846_s29  ;;  %v2123_v7 = vpack.i.bf16 %v699_v63, %v697_v62  ;;  %v852_v20 = vrot.slane %v2114_v60, 2  ;;  %v435_v24 = vrot.slane %v2059_v22, 1  ;;  %v802_v18 = vrot.slane %v388_v5, 1 }
  0x2f   : > { %1522 = vrot.lane.b32.xlu0 %v1501_v30, %s1845_s28  ;;  %v538_v30 = vrot.slane %v2047_v16, 2  ;;  %v855_v25 = vrot.slane %v388_v5, 2  ;;  %v437_v28 = vrot.slane %v2066_v26, 1  ;;  %v1851_v32 = vmov 0.0|0.0  }
  0x30   : > { %1393 = vmatprep.subr.bf16.mxu0 %v1851_v32 }
  0x31   : > { %v540_v40 = vsel %vm502_vm1, %v538_v30, %v539_v31  ;;  %v2143_v30 = vsel %vm413_vm0, %v800_v8, %v802_v18  ;;  %v2146_v31 = vsel %vm502_vm1, %v853_v15, %v855_v25  ;;  %v438_v37 = vsel %vm413_vm0, %v435_v24, %v437_v28 }
  0x32   : > { %1547 = vrot.lane.b32.xlu1 %v2019_v56, %s1844_s20  ;;  %v2098_v44 = vpack.i.bf16 %v542_v41, %v540_v40  ;;  %v2164_v40 = vld [vmem:[%s1930_s13 + $0x68] sm:$0xff]  ;;  %v376_v41 = vld [vmem:[%s1930_s13 + $0x70] sm:$0x3] }
  0x33   : > { %1532 = vrot.lane.b32.xlu0 %v1964_v12, %s1843_s19  ;;  %v452_v12 = vrot.slane %v382_v21, 1  ;;  %v434_v21 = vrot.slane %v2034_v3, 1  ;;  %v440_v53 = vrot.slane %v2164_v40, 1 }
  0x35   : > { %v453_v39 = vsel %vm413_vm0, %v450_v29, %v452_v12  ;;  %v2136_v29 = vsel %vm413_vm0, %v799_v19, %v800_v8  ;;  %v2139_v12 = vsel %vm502_vm1, %v852_v20, %v853_v15  ;;  %v1853_v19 = vmov 0.0  }
  0x36   : > { %1557 = vrot.lane.b32.xlu1 %v2043_v13, %s1848_s7  ;;  %v2096_v43 = vpack.i.bf16 %v453_v39, %v451_v34  ;;  %v1791_v26 = vpack.i.bf16 %v2143_v30, %v2136_v29  ;;  %v1796_v33 = vpack.i.bf16 %v2146_v31, %v2139_v12  ;;  %v436_v34 = vsel %vm413_vm0, %v434_v21, %v435_v24  ;;  %v2161_v39 = vld [vmem:[%s1930_s13 + $0x60] sm:$0xff] }
  0x37   : > { %1542 = vrot.lane.b32.xlu0 %v1991_v42, %s1849_s8  ;;  %v1591_v38 = vpack.i.bf16 %v438_v37, %v436_v34  ;;  %v1626_v50 = vpack.i.bf16 %v2164_v40, %v2161_v39  ;;  %1390 = vmatprep.mubr.msk.f32.mxu0 %vm1852_vm6, %v1853_v19 }
  0x3a   : > { %1567 = vrot.lane.b32.xlu1 %v1991_v42, %s1847_s30  ;;  %v644_v42 = vsel %vm413_vm0, %v642_v45, %v643_v49  ;;  %v529_v45 = vrot.slane %v2164_v40, 2  ;;  %v531_v49 = vrot.slane %v376_v41, 2 }
  0x3b   : > { %1552 = vrot.lane.b32.xlu0 %v2041_v11, %s1850_s9  ;;  %v2116_v61 = vpack.i.bf16 %v646_v59, %v644_v42  ;;  %v442_v42 = vrot.slane %v376_v41, 1 }
  0x3c   : > { %v532_v52 = vsel %vm502_vm1, %v529_v45, %v531_v49  ;;  %v1164_v49 = vld [vmem:[%s2457_s4] sm:$0xff] }
  0x3d   : > { %v443_v63 = vsel %vm413_vm0, %v440_v53, %v442_v42 }
  0x3e   : > { %1577 = vrot.lane.b32.xlu1 %v2041_v11, %s1846_s29 }
  0x3f   : > { %1562 = vrot.lane.b32.xlu0 %v2005_v48, %s1845_s28  ;;  %v1596_v48 = vpack.i.bf16 %v527_v14, %v525_v6  ;;  %v1746_v6 = vpack.i.bf16 %v2082_v36, %v2079_v35 }
  0x42   : > { %1587 = vrot.lane.b32.xlu1 %v1586_v55, %s1844_s20 }
  0x43   : > { %1572 = vrot.lane.b32.xlu0 %v2019_v56, %s1843_s19  ;;  %v528_v56 = vrot.slane %v2161_v39, 2 }
  0x45   : > { %v530_v51 = vsel %vm502_vm1, %v528_v56, %v529_v45  ;;  %v1854_v45 = vmov 0  }
  0x46   : > { %1597 = vrot.lane.b32.xlu1 %v1596_v48, %s1848_s7  ;;  %v1636_v59 = vpack.i.bf16 %v532_v52, %v530_v51  ;;  %1801 = vset.pattern.permute.xlu0 %v1854_v45 }
  0x47   : > { %1582 = vrot.lane.b32.xlu0 %v2043_v13, %s1849_s8  ;;  %1802 = vset.pattern.permute.xlu1 %v1854_v45 }
  0x4a   : > { %1607 = vrot.lane.b32.xlu1 %v2043_v13, %s1847_s30  ;;  %v439_v13 = vrot.slane %v2161_v39, 1 }
  0x4b   : > { %1592 = vrot.lane.b32.xlu0 %v1591_v38, %s1850_s9 }
  0x4c   : > { %v441_v62 = vsel %vm413_vm0, %v439_v13, %v440_v53 }
  0x4d   : > { %v1631_v5 = vpack.i.bf16 %v443_v63, %v441_v62 }
  0x4e   : > { %1617 = vrot.lane.b32.xlu1 %v1591_v38, %s1846_s29 }
  0x4f   : > { %1602 = vrot.lane.b32.xlu0 %v2041_v11, %s1845_s28  ;;  %v1666_v11 = vpack.i.bf16 %v2025_v58, %v2022_v57 }
  0x52   : > { %1627 = vrot.lane.b32.xlu1 %v1626_v50, %s1844_s20 }
  0x53   : > { %1612 = vrot.lane.b32.xlu0 %v1586_v55, %s1843_s19  ;;  %v1706_v55 = vpack.i.bf16 %v2050_v17, %v2047_v16 }
  0x56   : > { %1637 = vrot.lane.b32.xlu1 %v1636_v59, %s1848_s7 }
  0x57   : > { %1622 = vrot.lane.b32.xlu0 %v1596_v48, %s1849_s8 }
  0x5a   : > { %1647 = vrot.lane.b32.xlu1 %v1596_v48, %s1847_s30 }
  0x5b   : > { %1632 = vrot.lane.b32.xlu0 %v1631_v5, %s1850_s9 }
  0x5e   : > { %1657 = vrot.lane.b32.xlu1 %v1631_v5, %s1846_s29 }
  0x5f   : > { %1642 = vrot.lane.b32.xlu0 %v1591_v38, %s1845_s28  ;;  %v1171_v38 = vld [vmem:[%s2458_s5] sm:$0xff] }
  0x62   : > { %1667 = vrot.lane.b32.xlu1 %v1666_v11, %s1844_s20 }
  0x63   : > { %1652 = vrot.lane.b32.xlu0 %v1626_v50, %s1843_s19 }
  0x66   : > { %1677 = vrot.lane.b32.xlu1 %v2068_v27, %s1848_s7 }
  0x67   : > { %1662 = vrot.lane.b32.xlu0 %v1636_v59, %s1849_s8 }
  0x6a   : > { %1687 = vrot.lane.b32.xlu1 %v1636_v59, %s1847_s30 }
  0x6b   : > { %1672 = vrot.lane.b32.xlu0 %v2061_v23, %s1850_s9 }
  0x6e   : > { %1697 = vrot.lane.b32.xlu1 %v2061_v23, %s1846_s29 }
  0x6f   : > { %1682 = vrot.lane.b32.xlu0 %v1631_v5, %s1845_s28 }
  0x72   : > { %1707 = vrot.lane.b32.xlu1 %v1706_v55, %s1844_s20 }
  0x73   : > { %1692 = vrot.lane.b32.xlu0 %v1666_v11, %s1843_s19 }
  0x76   : > { %1717 = vrot.lane.b32.xlu1 %v2098_v44, %s1848_s7 }
  0x77   : > { %1702 = vrot.lane.b32.xlu0 %v2068_v27, %s1849_s8 }
  0x7a   : > { %1727 = vrot.lane.b32.xlu1 %v2068_v27, %s1847_s30 }
  0x7b   : > { %1712 = vrot.lane.b32.xlu0 %v2096_v43, %s1850_s9 }
  0x7e   : > { %1737 = vrot.lane.b32.xlu1 %v2096_v43, %s1846_s29 }
  0x7f   : > { %1722 = vrot.lane.b32.xlu0 %v2061_v23, %s1845_s28  ;;  %v1786_v23 = vpack.i.bf16 %v2106_v54, %v2114_v60 }
  0x82   : > { %1747 = vrot.lane.b32.xlu1 %v1746_v6, %s1844_s20 }
  0x83   : > { %1732 = vrot.lane.b32.xlu0 %v1706_v55, %s1843_s19 }
  0x86   : > { %1757 = vrot.lane.b32.xlu1 %v2123_v7, %s1848_s7 }
  0x87   : > { %1742 = vrot.lane.b32.xlu0 %v2098_v44, %s1849_s8 }
  0x8a   : > { %1767 = vrot.lane.b32.xlu1 %v2098_v44, %s1847_s30 }
  0x8b   : > { %1752 = vrot.lane.b32.xlu0 %v2116_v61, %s1850_s9 }
  0x8c   : > { %v1483_v27 = vpop.permute.xlu1 %1482 }
  0x8d   : > { %v1485_v20 = vunpack.i.h.bf16 %v1483_v27  ;;  %v1484_v21 = vunpack.i.l.bf16 %v1483_v27 }
  0x8e   : > { %1777 = vrot.lane.b32.xlu1 %v2116_v61, %s1846_s29 }
  0x8f   : > { %1762 = vrot.lane.b32.xlu0 %v2096_v43, %s1845_s28 }
  0x90   : > { %v1488_v35 = vpop.permute.xlu1 %1487 }
  0x91   : > { %v1493_v36 = vpop.permute.xlu0 %1492  ;;  %v1490_v29 = vunpack.i.h.bf16 %v1488_v35  ;;  %v1489_v30 = vunpack.i.l.bf16 %v1488_v35 }
  0x92   : > { %1787 = vrot.lane.b32.xlu1 %v1786_v23, %s1844_s20  ;;  %v1495_v8 = vunpack.i.h.bf16 %v1493_v36  ;;  %v1494_v14 = vunpack.i.l.bf16 %v1493_v36 }
  0x93   : > { %1772 = vrot.lane.b32.xlu0 %v1746_v6, %s1843_s19  ;;  %s1320_s19 = sshll.u32 %s2473_s22, 1 }
  0x94   : > { %v1503_v44 = vpop.permute.xlu1 %1502  ;;  %v907_v24 = vsel %vm905_vm2, %v1960_v10, %v1495_v8  ;;  %v906_v18 = vsel %vm905_vm2, %v1958_v9, %v1494_v14  ;;  %s356_s20 = sadd.s32 %s1320_s19, %s2477_s21 }
  0x95   : > { %v1498_v15 = vpop.permute.xlu0 %1497  ;;  %v1505_v60 = vunpack.i.h.bf16 %v1503_v44  ;;  %v1504_v61 = vunpack.i.l.bf16 %v1503_v44  ;;  %s1321_s28 = sshll.u32 %s356_s20, 3 }
  0x96   : > { %1797 = vrot.lane.b32.xlu1 %v1796_v33, %s1848_s7  ;;  %v1500_v43 = vunpack.i.h.bf16 %v1498_v15  ;;  %v1499_v54 = vunpack.i.l.bf16 %v1498_v15  ;;  %s358_s7 = scalar_lea.vmem %s2459_s6, %s1321_s28 }
  0x97   : > { %1782 = vrot.lane.b32.xlu0 %v2123_v7, %s1849_s8 }
  0x98   : > { %v1518_v25 = vpop.permute.xlu1 %1517  ;;  %v923_v28 = vsel %vm922_vm3, %v906_v18, %v1499_v54  ;;  %v924_v12 = vsel %vm922_vm3, %v907_v24, %v1500_v43 }
  0x99   : > { %v940_v48 = vsel %vm939_vm4, %v923_v28, %v1484_v21  ;;  %v941_v31 = vsel %vm939_vm4, %v924_v12, %v1485_v20  ;;  %v1508_v33 = vpop.permute.xlu0 %1507  ;;  %v1520_v50 = vunpack.i.h.bf16 %v1518_v25  ;;  %v1519_v51 = vunpack.i.l.bf16 %v1518_v25 }
  0x9a   : > { %v957_v34 = vsel %vm956_vm5, %v940_v48, %v1504_v61  ;;  %v958_v10 = vsel %vm956_vm5, %v941_v31, %v1505_v60  ;;  %v1510_v37 = vunpack.i.h.bf16 %v1508_v33  ;;  %v1509_v9 = vunpack.i.l.bf16 %v1508_v33  ;;  %1174 = vperm.xlu1 %1802, %v1171_v38  }
  0x9b   : > { %1792 = vrot.lane.b32.xlu0 %v1791_v26, %s1850_s9 }
  0x9c   : > { %v1528_v7 = vpop.permute.xlu1 %1527  ;;  %v974_v41 = vsel %vm973_vm7, %v957_v34, %v1509_v9  ;;  %v975_v56 = vsel %vm973_vm7, %v958_v10, %v1510_v37 }
  0x9d   : > { %v1513_v26 = vpop.permute.xlu0 %1512  ;;  %v991_v53 = vsel %vm990_vm8, %v974_v41, %v1489_v30  ;;  %v992_v42 = vsel %vm990_vm8, %v975_v56, %v1490_v29  ;;  %v1530_v36 = vunpack.i.h.bf16 %v1528_v7  ;;  %v1529_v8 = vunpack.i.l.bf16 %v1528_v7 }
  0x9e   : > { %v1515_v52 = vunpack.i.h.bf16 %v1513_v26  ;;  %v1514_v13 = vunpack.i.l.bf16 %v1513_v26 }
  0x9f   : > { %1167 = vperm.xlu0 %1801, %v1164_v49  }
  0xa0   : > { %v1538_v59 = vpop.permute.xlu1 %1537  ;;  %v1008_v62 = vsel %vm1007_vm9, %v991_v53, %v1514_v13  ;;  %v1009_v63 = vsel %vm1007_vm9, %v992_v42, %v1515_v52 }
  0xa1   : > { %v1523_v5 = vpop.permute.xlu0 %1522  ;;  %v1025_v11 = vsel %vm1024_vm10, %v1008_v62, %v1519_v51  ;;  %v1026_v55 = vsel %vm1024_vm10, %v1009_v63, %v1520_v50  ;;  %v1540_v20 = vunpack.i.h.bf16 %v1538_v59  ;;  %v1539_v21 = vunpack.i.l.bf16 %v1538_v59 }
  0xa2   : > { %v1525_v27 = vunpack.i.h.bf16 %v1523_v5  ;;  %v1524_v23 = vunpack.i.l.bf16 %v1523_v5  ;;  %v1394_v35 = vpack.c.bf16 %v1026_v55, %v1025_v11 }
  0xa4   : > { %v1548_v14 = vpop.permute.xlu1 %1547  ;;  %v909_v44 = vsel %vm905_vm2, %v1936_v1, %v1525_v27  ;;  %v908_v15 = vsel %vm905_vm2, %v1933_v0, %v1524_v23  ;;  %1396 = vmatpush3.bf16.xpose.msk.msra.mxu0 %vm2276_vm12, %v1394_v35 }
  0xa5   : > { %v1533_v43 = vpop.permute.xlu0 %1532  ;;  %1397 = vmatprep.subr.bf16.mxu0 %v1851_v32  ;;  %v925_v61 = vsel %vm922_vm3, %v908_v15, %v1529_v8  ;;  %v926_v19 = vsel %vm922_vm3, %v909_v44, %v1530_v36  ;;  %v1550_v31 = vunpack.i.h.bf16 %v1548_v14  ;;  %v1549_v33 = vunpack.i.l.bf16 %v1548_v14 }
  0xa6   : > { %v1535_v54 = vunpack.i.h.bf16 %v1533_v43  ;;  %v1534_v60 = vunpack.i.l.bf16 %v1533_v43 }
  0xa8   : > { %v1558_v24 = vpop.permute.xlu1 %1557  ;;  %v942_v1 = vsel %vm939_vm4, %v925_v61, %v1534_v60  ;;  %v943_v18 = vsel %vm939_vm4, %v926_v19, %v1535_v54 }
  0xa9   : > { %v1543_v0 = vpop.permute.xlu0 %1542  ;;  %v959_v12 = vsel %vm956_vm5, %v942_v1, %v1539_v21  ;;  %v960_v48 = vsel %vm956_vm5, %v943_v18, %v1540_v20  ;;  %v1560_v7 = vunpack.i.h.bf16 %v1558_v24  ;;  %v1559_v38 = vunpack.i.l.bf16 %v1558_v24 }
  0xaa   : > { %v1545_v25 = vunpack.i.h.bf16 %v1543_v0  ;;  %v1544_v28 = vunpack.i.l.bf16 %v1543_v0 }
  0xac   : > { %v1568_v34 = vpop.permute.xlu1 %1567  ;;  %v976_v10 = vsel %vm973_vm7, %v959_v12, %v1544_v28  ;;  %v977_v37 = vsel %vm973_vm7, %v960_v48, %v1545_v25 }
  0xad   : > { %v1553_v9 = vpop.permute.xlu0 %1552  ;;  %v993_v45 = vsel %vm990_vm8, %v976_v10, %v1549_v33  ;;  %v994_v49 = vsel %vm990_vm8, %v977_v37, %v1550_v31  ;;  %v1570_v59 = vunpack.i.h.bf16 %v1568_v34  ;;  %v1569_v62 = vunpack.i.l.bf16 %v1568_v34 }
  0xae   : > { %v1555_v41 = vunpack.i.h.bf16 %v1553_v9  ;;  %v1554_v56 = vunpack.i.l.bf16 %v1553_v9 }
  0xb0   : > { %v1578_v29 = vpop.permute.xlu1 %1577  ;;  %v1010_v30 = vsel %vm1007_vm9, %v993_v45, %v1554_v56  ;;  %v1011_v26 = vsel %vm1007_vm9, %v994_v49, %v1555_v41 }
  0xb1   : > { %v1027_v50 = vsel %vm1024_vm10, %v1010_v30, %v1559_v38  ;;  %v1028_v51 = vsel %vm1024_vm10, %v1011_v26, %v1560_v7  ;;  %v1563_v52 = vpop.permute.xlu0 %1562  ;;  %v1580_v8 = vunpack.i.h.bf16 %v1578_v29  ;;  %v1579_v14 = vunpack.i.l.bf16 %v1578_v29 }
  0xb2   : > { %v1398_v13 = vpack.c.bf16 %v1028_v51, %v1027_v50  ;;  %v1565_v53 = vunpack.i.h.bf16 %v1563_v52  ;;  %v1564_v42 = vunpack.i.l.bf16 %v1563_v52 }
  0xb4   : > { %v1588_v63 = vpop.permute.xlu1 %1587  ;;  %v911_v5 = vsel %vm905_vm2, %v1947_v4, %v1565_v53  ;;  %v910_v11 = vsel %vm905_vm2, %v1941_v2, %v1564_v42  ;;  %1400 = vmatpush3.bf16.xpose.msk.msra.mxu0 %vm2276_vm12, %v1398_v13 }
  0xb5   : > { %v1573_v55 = vpop.permute.xlu0 %1572  ;;  %1401 = vmatprep.subr.bf16.mxu0 %v1851_v32  ;;  %v927_v35 = vsel %vm922_vm3, %v910_v11, %v1569_v62  ;;  %v928_v36 = vsel %vm922_vm3, %v911_v5, %v1570_v59  ;;  %v1590_v19 = vunpack.i.h.bf16 %v1588_v63  ;;  %v1589_v20 = vunpack.i.l.bf16 %v1588_v63 }
  0xb6   : > { %v1575_v27 = vunpack.i.h.bf16 %v1573_v55  ;;  %v1574_v23 = vunpack.i.l.bf16 %v1573_v55 }
  0xb8   : > { %v1598_v44 = vpop.permute.xlu1 %1597  ;;  %v944_v4 = vsel %vm939_vm4, %v927_v35, %v1574_v23  ;;  %v945_v15 = vsel %vm939_vm4, %v928_v36, %v1575_v27 }
  0xb9   : > { %v1583_v2 = vpop.permute.xlu0 %1582  ;;  %v961_v60 = vsel %vm956_vm5, %v944_v4, %v1579_v14  ;;  %v962_v61 = vsel %vm956_vm5, %v945_v15, %v1580_v8  ;;  %v1600_v0 = vunpack.i.h.bf16 %v1598_v44  ;;  %v1599_v25 = vunpack.i.l.bf16 %v1598_v44 }
  0xba   : > { %v1585_v43 = vunpack.i.h.bf16 %v1583_v2  ;;  %v1584_v54 = vunpack.i.l.bf16 %v1583_v2 }
  0xbc   : > { %v1608_v21 = vpop.permute.xlu1 %1607  ;;  %v978_v24 = vsel %vm973_vm7, %v961_v60, %v1584_v54  ;;  %v979_v1 = vsel %vm973_vm7, %v962_v61, %v1585_v43 }
  0xbd   : > { %v1593_v18 = vpop.permute.xlu0 %1592  ;;  %v995_v48 = vsel %vm990_vm8, %v978_v24, %v1589_v20  ;;  %v996_v31 = vsel %vm990_vm8, %v979_v1, %v1590_v19  ;;  %v1610_v45 = vunpack.i.h.bf16 %v1608_v21  ;;  %v1609_v49 = vunpack.i.l.bf16 %v1608_v21 }
  0xbe   : > { %v1595_v28 = vunpack.i.h.bf16 %v1593_v18  ;;  %v1594_v12 = vunpack.i.l.bf16 %v1593_v18 }
  0xc0   : > { %v1618_v33 = vpop.permute.xlu1 %1617  ;;  %v1012_v34 = vsel %vm1007_vm9, %v995_v48, %v1594_v12  ;;  %v1013_v10 = vsel %vm1007_vm9, %v996_v31, %v1595_v28 }
  0xc1   : > { %v1029_v37 = vsel %vm1024_vm10, %v1012_v34, %v1599_v25  ;;  %v1030_v9 = vsel %vm1024_vm10, %v1013_v10, %v1600_v0  ;;  %v1603_v7 = vpop.permute.xlu0 %1602  ;;  %v1620_v42 = vunpack.i.h.bf16 %v1618_v33  ;;  %v1619_v59 = vunpack.i.l.bf16 %v1618_v33 }
  0xc2   : > { %v1402_v38 = vpack.c.bf16 %v1030_v9, %v1029_v37  ;;  %v1605_v41 = vunpack.i.h.bf16 %v1603_v7  ;;  %v1604_v56 = vunpack.i.l.bf16 %v1603_v7 }
  0xc4   : > { %v1628_v29 = vpop.permute.xlu1 %1627  ;;  %v913_v30 = vsel %vm905_vm2, %v2002_v47, %v1605_v41  ;;  %v912_v26 = vsel %vm905_vm2, %v1999_v46, %v1604_v56  ;;  %1404 = vmatpush3.bf16.xpose.msk.msra.mxu0 %vm2276_vm12, %v1402_v38 }
  0xc5   : > { %v1613_v50 = vpop.permute.xlu0 %1612  ;;  %1405 = vmatprep.subr.bf16.mxu0 %v1851_v32  ;;  %v929_v13 = vsel %vm922_vm3, %v912_v26, %v1609_v49  ;;  %v930_v53 = vsel %vm922_vm3, %v913_v30, %v1610_v45  ;;  %v1630_v23 = vunpack.i.h.bf16 %v1628_v29  ;;  %v1629_v35 = vunpack.i.l.bf16 %v1628_v29 }
  0xc6   : > { %v1615_v51 = vunpack.i.h.bf16 %v1613_v50  ;;  %v1614_v52 = vunpack.i.l.bf16 %v1613_v50 }
  0xc8   : > { %v1638_v62 = vpop.permute.xlu1 %1637  ;;  %v946_v47 = vsel %vm939_vm4, %v929_v13, %v1614_v52  ;;  %v947_v63 = vsel %vm939_vm4, %v930_v53, %v1615_v51 }
  0xc9   : > { %v1623_v46 = vpop.permute.xlu0 %1622  ;;  %v963_v55 = vsel %vm956_vm5, %v946_v47, %v1619_v59  ;;  %v964_v27 = vsel %vm956_vm5, %v947_v63, %v1620_v42  ;;  %v1640_v4 = vunpack.i.h.bf16 %v1638_v62  ;;  %v1639_v15 = vunpack.i.l.bf16 %v1638_v62 }
  0xca   : > { %v1625_v5 = vunpack.i.h.bf16 %v1623_v46  ;;  %v1624_v11 = vunpack.i.l.bf16 %v1623_v46 }
  0xcc   : > { %v1648_v36 = vpop.permute.xlu1 %1647  ;;  %v980_v8 = vsel %vm973_vm7, %v963_v55, %v1624_v11  ;;  %v981_v14 = vsel %vm973_vm7, %v964_v27, %v1625_v5 }
  0xcd   : > { %v1633_v44 = vpop.permute.xlu0 %1632  ;;  %v997_v54 = vsel %vm990_vm8, %v980_v8, %v1629_v35  ;;  %v998_v60 = vsel %vm990_vm8, %v981_v14, %v1630_v23  ;;  %v1650_v28 = vunpack.i.h.bf16 %v1648_v36  ;;  %v1649_v12 = vunpack.i.l.bf16 %v1648_v36 }
  0xce   : > { %v1635_v2 = vunpack.i.h.bf16 %v1633_v44  ;;  %v1634_v43 = vunpack.i.l.bf16 %v1633_v44 }
  0xd0   : > { %v1658_v61 = vpop.permute.xlu1 %1657  ;;  %v1014_v19 = vsel %vm1007_vm9, %v997_v54, %v1634_v43  ;;  %v1015_v20 = vsel %vm1007_vm9, %v998_v60, %v1635_v2 }
  0xd1   : > { %v1031_v21 = vsel %vm1024_vm10, %v1014_v19, %v1639_v15  ;;  %v1032_v24 = vsel %vm1024_vm10, %v1015_v20, %v1640_v4  ;;  %v1643_v1 = vpop.permute.xlu0 %1642  ;;  %v1660_v38 = vunpack.i.h.bf16 %v1658_v61  ;;  %v1659_v41 = vunpack.i.l.bf16 %v1658_v61 }
  0xd2   : > { %v1406_v18 = vpack.c.bf16 %v1032_v24, %v1031_v21  ;;  %v1645_v0 = vunpack.i.h.bf16 %v1643_v1  ;;  %v1644_v25 = vunpack.i.l.bf16 %v1643_v1 }
  0xd4   : > { %v1668_v48 = vpop.permute.xlu1 %1667  ;;  %v915_v31 = vsel %vm905_vm2, %v2059_v22, %v1645_v0  ;;  %v914_v33 = vsel %vm905_vm2, %v2034_v3, %v1644_v25  ;;  %1408 = vmatpush3.bf16.xpose.msk.msra.mxu0 %vm2276_vm12, %v1406_v18 }
  0xd5   : > { %v1653_v34 = vpop.permute.xlu0 %1652  ;;  %1409 = vmatprep.subr.bf16.mxu0 %v1851_v32  ;;  %v931_v9 = vsel %vm922_vm3, %v914_v33, %v1649_v12  ;;  %v932_v7 = vsel %vm922_vm3, %v915_v31, %v1650_v28  ;;  %v1670_v50 = vunpack.i.h.bf16 %v1668_v48  ;;  %v1669_v51 = vunpack.i.l.bf16 %v1668_v48 }
  0xd6   : > { %v1655_v10 = vunpack.i.h.bf16 %v1653_v34  ;;  %v1654_v37 = vunpack.i.l.bf16 %v1653_v34 }
  0xd8   : > { %v1678_v56 = vpop.permute.xlu1 %1677  ;;  %v948_v22 = vsel %vm939_vm4, %v931_v9, %v1654_v37  ;;  %v949_v45 = vsel %vm939_vm4, %v932_v7, %v1655_v10 }
  0xd9   : > { %v1663_v3 = vpop.permute.xlu0 %1662  ;;  %v965_v30 = vsel %vm956_vm5, %v948_v22, %v1659_v41  ;;  %v966_v26 = vsel %vm956_vm5, %v949_v45, %v1660_v38  ;;  %v1680_v59 = vunpack.i.h.bf16 %v1678_v56  ;;  %v1679_v62 = vunpack.i.l.bf16 %v1678_v56 }
  0xda   : > { %v1665_v49 = vunpack.i.h.bf16 %v1663_v3  ;;  %v1664_v29 = vunpack.i.l.bf16 %v1663_v3 }
  0xdc   : > { %v1688_v52 = vpop.permute.xlu1 %1687  ;;  %v982_v13 = vsel %vm973_vm7, %v965_v30, %v1664_v29  ;;  %v983_v53 = vsel %vm973_vm7, %v966_v26, %v1665_v49 }
  0xdd   : > { %v1673_v42 = vpop.permute.xlu0 %1672  ;;  %v999_v46 = vsel %vm990_vm8, %v982_v13, %v1669_v51  ;;  %v1000_v5 = vsel %vm990_vm8, %v983_v53, %v1670_v50  ;;  %v1690_v4 = vunpack.i.h.bf16 %v1688_v52  ;;  %v1689_v15 = vunpack.i.l.bf16 %v1688_v52 }
  0xde   : > { %v1675_v47 = vunpack.i.h.bf16 %v1673_v42  ;;  %v1674_v63 = vunpack.i.l.bf16 %v1673_v42 }
  0xe0   : > { %v1698_v11 = vpop.permute.xlu1 %1697  ;;  %v1016_v55 = vsel %vm1007_vm9, %v999_v46, %v1674_v63  ;;  %v1017_v27 = vsel %vm1007_vm9, %v1000_v5, %v1675_v47 }
  0xe1   : > { %v1033_v23 = vsel %vm1024_vm10, %v1016_v55, %v1679_v62  ;;  %v1034_v35 = vsel %vm1024_vm10, %v1017_v27, %v1680_v59  ;;  %v1683_v36 = vpop.permute.xlu0 %1682  ;;  %v1700_v24 = vunpack.i.h.bf16 %v1698_v11  ;;  %v1699_v1 = vunpack.i.l.bf16 %v1698_v11 }
  0xe2   : > { %v1410_v8 = vpack.c.bf16 %v1034_v35, %v1033_v23  ;;  %v1685_v14 = vunpack.i.h.bf16 %v1683_v36  ;;  %v1684_v44 = vunpack.i.l.bf16 %v1683_v36 }
  0xe4   : > { %v1708_v2 = vpop.permute.xlu1 %1707  ;;  %v917_v43 = vsel %vm905_vm2, %v2164_v40, %v1685_v14  ;;  %v916_v54 = vsel %vm905_vm2, %v2161_v39, %v1684_v44  ;;  %1412 = vmatpush3.bf16.xpose.msk.msra.mxu0 %vm2276_vm12, %v1410_v8 }
  0xe5   : > { %v1693_v60 = vpop.permute.xlu0 %1692  ;;  %1413 = vmatprep.subr.bf16.mxu0 %v1851_v32  ;;  %v933_v20 = vsel %vm922_vm3, %v916_v54, %v1689_v15  ;;  %v934_v21 = vsel %vm922_vm3, %v917_v43, %v1690_v4  ;;  %v1710_v31 = vunpack.i.h.bf16 %v1708_v2  ;;  %v1709_v33 = vunpack.i.l.bf16 %v1708_v2 }
  0xe6   : > { %v1695_v61 = vunpack.i.h.bf16 %v1693_v60  ;;  %v1694_v19 = vunpack.i.l.bf16 %v1693_v60 }
  0xe8   : > { %v1718_v18 = vpop.permute.xlu1 %1717  ;;  %v950_v40 = vsel %vm939_vm4, %v933_v20, %v1694_v19  ;;  %v951_v0 = vsel %vm939_vm4, %v934_v21, %v1695_v61 }
  0xe9   : > { %v1703_v39 = vpop.permute.xlu0 %1702  ;;  %v967_v12 = vsel %vm956_vm5, %v950_v40, %v1699_v1  ;;  %v968_v48 = vsel %vm956_vm5, %v951_v0, %v1700_v24  ;;  %v1720_v7 = vunpack.i.h.bf16 %v1718_v18  ;;  %v1719_v38 = vunpack.i.l.bf16 %v1718_v18 }
  0xea   : > { %v1705_v25 = vunpack.i.h.bf16 %v1703_v39  ;;  %v1704_v28 = vunpack.i.l.bf16 %v1703_v39 }
  0xec   : > { %v1728_v34 = vpop.permute.xlu1 %1727  ;;  %v984_v10 = vsel %vm973_vm7, %v967_v12, %v1704_v28  ;;  %v985_v37 = vsel %vm973_vm7, %v968_v48, %v1705_v25 }
  0xed   : > { %v1713_v9 = vpop.permute.xlu0 %1712  ;;  %v1001_v22 = vsel %vm990_vm8, %v984_v10, %v1709_v33  ;;  %v1002_v45 = vsel %vm990_vm8, %v985_v37, %v1710_v31  ;;  %v1730_v53 = vunpack.i.h.bf16 %v1728_v34  ;;  %v1729_v42 = vunpack.i.l.bf16 %v1728_v34 }
  0xee   : > { %v1715_v41 = vunpack.i.h.bf16 %v1713_v9  ;;  %v1714_v56 = vunpack.i.l.bf16 %v1713_v9 }
  0xf0   : > { %v1738_v3 = vpop.permute.xlu1 %1737  ;;  %v1018_v49 = vsel %vm1007_vm9, %v1001_v22, %v1714_v56  ;;  %v1019_v29 = vsel %vm1007_vm9, %v1002_v45, %v1715_v41 }
  0xf1   : > { %v1035_v30 = vsel %vm1024_vm10, %v1018_v49, %v1719_v38  ;;  %v1036_v26 = vsel %vm1024_vm10, %v1019_v29, %v1720_v7  ;;  %v1723_v50 = vpop.permute.xlu0 %1722  ;;  %v1740_v27 = vunpack.i.h.bf16 %v1738_v3  ;;  %v1739_v23 = vunpack.i.l.bf16 %v1738_v3 }
  0xf2   : > { %v1414_v51 = vpack.c.bf16 %v1036_v26, %v1035_v30  ;;  %v1725_v52 = vunpack.i.h.bf16 %v1723_v50  ;;  %v1724_v13 = vunpack.i.l.bf16 %v1723_v50 }
  0xf4   : > { %v1748_v59 = vpop.permute.xlu1 %1747  ;;  %v919_v62 = vsel %vm905_vm2, %v2025_v58, %v1725_v52  ;;  %v918_v47 = vsel %vm905_vm2, %v2022_v57, %v1724_v13  ;;  %1416 = vmatpush3.bf16.xpose.msk.msra.mxu0 %vm2276_vm12, %v1414_v51 }
  0xf5   : > { %v1733_v63 = vpop.permute.xlu0 %1732  ;;  %1417 = vmatprep.subr.bf16.mxu0 %v1851_v32  ;;  %v935_v11 = vsel %vm922_vm3, %v918_v47, %v1729_v42  ;;  %v936_v55 = vsel %vm922_vm3, %v919_v62, %v1730_v53  ;;  %v1750_v15 = vunpack.i.h.bf16 %v1748_v59  ;;  %v1749_v2 = vunpack.i.l.bf16 %v1748_v59 }
  0xf6   : > { %v1735_v46 = vunpack.i.h.bf16 %v1733_v63  ;;  %v1734_v5 = vunpack.i.l.bf16 %v1733_v63 }
  0xf8   : > { %v1758_v35 = vpop.permute.xlu1 %1757  ;;  %v952_v58 = vsel %vm939_vm4, %v935_v11, %v1734_v5  ;;  %v953_v36 = vsel %vm939_vm4, %v936_v55, %v1735_v46 }
  0xf9   : > { %v1743_v57 = vpop.permute.xlu0 %1742  ;;  %v969_v44 = vsel %vm956_vm5, %v952_v58, %v1739_v23  ;;  %v970_v4 = vsel %vm956_vm5, %v953_v36, %v1740_v27  ;;  %v1760_v19 = vunpack.i.h.bf16 %v1758_v35  ;;  %v1759_v20 = vunpack.i.l.bf16 %v1758_v35  ;;  %v1041_v36 = vld [vmem:[%s2456_s3] sm:$0xff] }
  0xfa   : > { %v1745_v8 = vunpack.i.h.bf16 %v1743_v57  ;;  %v1744_v14 = vunpack.i.l.bf16 %v1743_v57 }
  0xfc   : > { %v1768_v43 = vpop.permute.xlu1 %1767  ;;  %v986_v54 = vsel %vm973_vm7, %v969_v44, %v1744_v14  ;;  %v987_v60 = vsel %vm973_vm7, %v970_v4, %v1745_v8 }
  0xfd   : > { %v1753_v61 = vpop.permute.xlu0 %1752  ;;  %v1003_v1 = vsel %vm990_vm8, %v986_v54, %v1749_v2  ;;  %v1004_v18 = vsel %vm990_vm8, %v987_v60, %v1750_v15  ;;  %v1770_v34 = vunpack.i.h.bf16 %v1768_v43  ;;  %v1769_v10 = vunpack.i.l.bf16 %v1768_v43 }
  0xfe   : > { %v1755_v21 = vunpack.i.h.bf16 %v1753_v61  ;;  %v1754_v24 = vunpack.i.l.bf16 %v1753_v61 }
 0x100   : > { %v1778_v40 = vpop.permute.xlu1 %1777  ;;  %v1020_v0 = vsel %vm1007_vm9, %v1003_v1, %v1754_v24  ;;  %v1021_v39 = vsel %vm1007_vm9, %v1004_v18, %v1755_v21 }
 0x101   : > { %v1037_v25 = vsel %vm1024_vm10, %v1020_v0, %v1759_v20  ;;  %v1038_v28 = vsel %vm1024_vm10, %v1021_v39, %v1760_v19  ;;  %v1763_v12 = vpop.permute.xlu0 %1762  ;;  %v1780_v3 = vunpack.i.h.bf16 %v1778_v40  ;;  %v1779_v49 = vunpack.i.l.bf16 %v1778_v40 }
 0x102   : > { %v1418_v48 = vpack.c.bf16 %v1038_v28, %v1037_v25  ;;  %v1765_v31 = vunpack.i.h.bf16 %v1763_v12  ;;  %v1764_v33 = vunpack.i.l.bf16 %v1763_v12 }
 0x104   : > { %v921_v37 = vsel %vm905_vm2, %v2050_v17, %v1765_v31  ;;  %v920_v9 = vsel %vm905_vm2, %v2047_v16, %v1764_v33  ;;  %1420 = vmatpush3.bf16.xpose.msk.msra.mxu0 %vm2276_vm12, %v1418_v48  ;;  %v1788_v7 = vpop.permute.xlu1 %1787 }
 0x105   : > { %v1773_v38 = vpop.permute.xlu0 %1772  ;;  %1421 = vmatprep.subr.bf16.mxu0 %v1851_v32  ;;  %v937_v22 = vsel %vm922_vm3, %v920_v9, %v1769_v10  ;;  %v938_v45 = vsel %vm922_vm3, %v921_v37, %v1770_v34  ;;  %v1790_v52 = vunpack.i.h.bf16 %v1788_v7  ;;  %v1789_v13 = vunpack.i.l.bf16 %v1788_v7 }
 0x106   : > { %v1775_v41 = vunpack.i.h.bf16 %v1773_v38  ;;  %v1774_v56 = vunpack.i.l.bf16 %v1773_v38 }
 0x108   : > { %v954_v17 = vsel %vm939_vm4, %v937_v22, %v1774_v56  ;;  %v955_v29 = vsel %vm939_vm4, %v938_v45, %v1775_v41  ;;  %v1798_v50 = vpop.permute.xlu1 %1797 }
 0x109   : > { %v1783_v16 = vpop.permute.xlu0 %1782  ;;  %v971_v51 = vsel %vm956_vm5, %v954_v17, %v1779_v49  ;;  %v972_v32 = vsel %vm956_vm5, %v955_v29, %v1780_v3  ;;  %v1800_v62 = vunpack.i.h.bf16 %v1798_v50  ;;  %v1799_v47 = vunpack.i.l.bf16 %v1798_v50 }
 0x10a   : > { %v1785_v30 = vunpack.i.h.bf16 %v1783_v16  ;;  %v1784_v26 = vunpack.i.l.bf16 %v1783_v16 }
 0x10c   : > { %v988_v53 = vsel %vm973_vm7, %v971_v51, %v1784_v26  ;;  %v989_v42 = vsel %vm973_vm7, %v972_v32, %v1785_v30 }
 0x10d   : > { %v1793_v59 = vpop.permute.xlu0 %1792  ;;  %v1005_v5 = vsel %vm990_vm8, %v988_v53, %v1789_v13  ;;  %v1006_v11 = vsel %vm990_vm8, %v989_v42, %v1790_v52 }
 0x10e   : > { %v1795_v63 = vunpack.i.h.bf16 %v1793_v59  ;;  %v1794_v46 = vunpack.i.l.bf16 %v1793_v59 }
 0x110   : > { %v1022_v55 = vsel %vm1007_vm9, %v1005_v5, %v1794_v46  ;;  %v1023_v27 = vsel %vm1007_vm9, %v1006_v11, %v1795_v63 }
 0x111   : > { %v1039_v23 = vsel %vm1024_vm10, %v1022_v55, %v1799_v47  ;;  %v1040_v35 = vsel %vm1024_vm10, %v1023_v27, %v1800_v62 }
 0x112   : > { %v1422_v58 = vpack.c.bf16 %v1040_v35, %v1039_v23 }
 0x114   : > { %1424 = vmatpush3.bf16.xpose.msk.msra.mxu0 %vm2276_vm12, %v1422_v58 }
 0x119   : > { %v1175_v14 = vpop.permute.xlu1 %1174 }
 0x11b   : > { %1391 = vmatmul.mubr.msk.f32.vlgmr.msra.gmra.mrb[0].mxu0 %vm1042_vm11, %v1041_v36 }
 0x11e   : > { %v1168_v57 = vpop.permute.xlu0 %1167 }
 0x1ee   : > { %v1160_v8 = vpop.f32.mrb[0].mxu0 }
 0x1ef   : > { %v1170_v44 = vmul.f32 %v1168_v57, %v1160_v8  ;;  %v1392_v4 = vpop.f32.mrb[1].mxu0 }
 0x1f1   : > { %v1177_v15 = vadd.f32 %v1175_v14, %v1170_v44 }
 0x1f3   : > { %v1178_v6 = vmax.f32 %v1177_v15, 0.0 }
 0x1f5   : > { %1179 = vst [vmem:[%s358_s7] sm:$0xff] %v1178_v6 }
 0x1f6 PF: > { %s16_s25 = sadd.s32 1, %s1841_s25   ;;  %s2462_s21 = smov %s1833_s23 }
 0x1f7   : > { %p13_p8 = scmp.ge.s32.totalorder %s16_s25, 6   ;;  %s2463_s22 = smov %s1837_s24 }
 0x1f8   : > { %s2464_s23 = smov %s2467_s26  ;;  %s2465_s24 = smov %s2471_s27 }
 0x1f9   :  { %15 = sbr.rel (!%p13_p8) target bundleno = 3 (0x3), region = 80 }

</bundles_post_ra>
